<compile_context>
chip_gen: v6e
topology: v6e:2x2x1
jax: 0.10.0
libtpu: 0.0.40
codegen_flags: <defaults>
</compile_context>

<pallas_src>
import jax
import jax.numpy as jnp
from jax.experimental import pallas as pl
from jax.experimental.pallas import tpu as pltpu

IN_DIM = 768
HID_DIM = 512
OUT_DIM = 1


def _round_up(x, m):
    return ((x + m - 1) // m) * m


def _critic_kernel(x_ref, w1_ref, b1_ref, w2_ref, b2_ref, o_ref):
    # x_ref:  (TM, 768)   bf16  VMEM   -- batch tile
    # w1_ref: (768, 512)  bf16  VMEM   -- resident across the grid
    # b1_ref: (1, 512)    f32   VMEM
    # w2_ref: (1, 512)    f32   VMEM   -- second-layer weight as a row vector
    # b2_ref: (1, 1)      f32   VMEM
    # o_ref:  (TM, 1)     f32   VMEM
    # Layer 1: bf16 MXU matmul with f32 accumulate; bias + ReLU in f32
    # (v5e has no bf16 VPU path, so keep elementwise math in f32).
    h = jnp.dot(x_ref[...], w1_ref[...], preferred_element_type=jnp.float32)
    h = jnp.maximum(h + b1_ref[...], 0.0)
    # Dropout: identity in eval mode.
    # Layer 2 (512 -> 1): VPU broadcast-multiply + XLU lane reduction instead of
    # an N=1 MXU matvec (frees the MXU, no lane-padded (512,128) W2 buffer).
    v = jnp.sum(h * w2_ref[...], axis=-1, keepdims=True) + b2_ref[...]
    # Output stays a (TM, 1) column: it is ~0.1% of the kernel's bytes and a
    # (TM,1)->(1,TM) relayout to make it lane-dense would cost more than the
    # masked stores it removes.
    o_ref[...] = v.astype(o_ref.dtype)


def critic_forward(state, w1, b1, w2, b2, *, block_m=512):
    """state: [B, 768] -> [B] float32 critic values.

    block_m: batch-tile rows (default 512; sweep 256-1024 per part).
    """
    B, D = state.shape
    assert D == IN_DIM

    # bf16 MXU inputs (f32 accumulate inside the kernel).
    x = state.astype(jnp.bfloat16)
    w1 = w1.astype(jnp.bfloat16)
    b1 = b1.reshape(1, HID_DIM).astype(jnp.float32)
    w2 = w2.reshape(1, HID_DIM).astype(jnp.float32)   # row-vector layout
    b2 = b2.reshape(1, OUT_DIM).astype(jnp.float32)

    # Padding path: small batches collapse to a single tile; large batches keep
    # multiple tiles so "parallel" can shard them across v7x's two TensorCores.
    tile_m = min(block_m, _round_up(B, 128))
    tile_m = _round_up(tile_m, 128)
    padded_b = _round_up(B, tile_m)
    if padded_b != B:
        x = jnp.pad(x, ((0, padded_b - B), (0, 0)))

    grid = (padded_b // tile_m,)

    out = pl.pallas_call(
        _critic_kernel,
        out_shape=jax.ShapeDtypeStruct((padded_b, OUT_DIM), jnp.float32),
        grid_spec=pltpu.PrefetchScalarGridSpec(
            num_scalar_prefetch=0,
            grid=grid,
            in_specs=[
                pl.BlockSpec((tile_m, IN_DIM), lambda i: (i, 0)),    # x tile
                pl.BlockSpec((IN_DIM, HID_DIM), lambda i: (0, 0)),   # W1 (resident)
                pl.BlockSpec((1, HID_DIM), lambda i: (0, 0)),        # b1
                pl.BlockSpec((1, HID_DIM), lambda i: (0, 0)),        # W2 row
                pl.BlockSpec((1, OUT_DIM), lambda i: (0, 0)),        # b2
            ],
            out_specs=pl.BlockSpec((tile_m, OUT_DIM), lambda i: (i, 0)),
        ),
        compiler_params=pltpu.CompilerParams(
            dimension_semantics=("parallel",),
            # Headroom for block_m up to ~1024 (default scoped VMEM is 16/32 MiB)
            # while staying under v7x's 64 MiB physical VMEM.
            vmem_limit_bytes=48 * 1024 * 1024,
        ),
    )(x, w1, b1, w2, b2)

    # .squeeze() + drop padded rows (wrapper glue, not hot path).
    return out[:B, 0]


def init_params(key):
    """nn.Linear-style init (uniform +/- 1/sqrt(fan_in)); W1 stored bf16 for the MXU."""
    k1, k2, k3, k4 = jax.random.split(key, 4)
    bound1 = 1.0 / jnp.sqrt(jnp.float32(IN_DIM))
    bound2 = 1.0 / jnp.sqrt(jnp.float32(HID_DIM))
    w1 = jax.random.uniform(k1, (IN_DIM, HID_DIM), jnp.float32, -bound1, bound1)
    b1 = jax.random.uniform(k2, (1, HID_DIM), jnp.float32, -bound1, bound1)
    # Second-layer weight kept as a (1, 512) row (same storage as torch's
    # nn.Linear(512, 1).weight) for the VPU mul+reduce head.
    w2 = jax.random.uniform(k3, (1, HID_DIM), jnp.float32, -bound2, bound2)
    b2 = jax.random.uniform(k4, (1, OUT_DIM), jnp.float32, -bound2, bound2)
    return w1.astype(jnp.bfloat16), b1, w2, b2


if __name__ == "__main__":
    key = jax.random.PRNGKey(0)
    k_state, k_params = jax.random.split(key)

    B = 6  # small batch, deliberately NOT tile-aligned -> exercises padding path
    state = jax.random.normal(k_state, (B, IN_DIM), jnp.float32)
    w1, b1, w2, b2 = init_params(k_params)

    values = critic_forward(state, w1, b1, w2, b2)
    values = jax.block_until_ready(values)
    assert values.shape == (B,)

    # Reference at matching precision (bf16 MXU inputs, f32 accumulate);
    # dropout = identity in eval mode.
    h_ref = jnp.maximum(
        jnp.dot(state.astype(jnp.bfloat16), w1.astype(jnp.bfloat16),
                preferred_element_type=jnp.float32) + b1, 0.0)
    ref = jnp.sum(h_ref * w2, axis=-1) + b2[0, 0]
    assert jnp.allclose(values, ref, atol=1e-3, rtol=1e-3)

    print("KERNEL_OK")
</pallas_src>

<mosaic_0001>
module attributes {stable_mosaic.version = 11 : i64} {
  func.func @_critic_kernel(%arg0: i32, %arg1: memref<128x768xbf16, #tpu.memory_space<vmem>>, %arg2: memref<768x512xbf16, #tpu.memory_space<vmem>>, %arg3: memref<1x512xf32, #tpu.memory_space<vmem>>, %arg4: memref<1x512xf32, #tpu.memory_space<vmem>>, %arg5: memref<1x1xf32, #tpu.memory_space<vmem>>, %arg6: memref<128x1xf32, #tpu.memory_space<vmem>>) attributes {dimension_semantics = [#tpu.dimension_semantics<parallel>], iteration_bounds = array<i64: 1>, scalar_prefetch = 0 : i64, scratch_operands = 0 : i64, tpu.core_type = #tpu.core_type<tc>, window_params = [{transform_indices = @transform_0, window_bounds = array<i64: 128, 768>}, {pipeline_mode = #tpu.pipeline_mode<synchronous>, transform_indices = @transform_1, window_bounds = array<i64: 768, 512>}, {pipeline_mode = #tpu.pipeline_mode<synchronous>, transform_indices = @transform_2, window_bounds = array<i64: 1, 512>}, {pipeline_mode = #tpu.pipeline_mode<synchronous>, transform_indices = @transform_3, window_bounds = array<i64: 1, 512>}, {pipeline_mode = #tpu.pipeline_mode<synchronous>, transform_indices = @transform_4, window_bounds = array<i64: 1, 1>}, {transform_indices = @transform_5, window_bounds = array<i64: 128, 1>}]} {
    %c0 = arith.constant 0 : index
    %c0_0 = arith.constant 0 : index
    %0 = vector.load %arg1[%c0, %c0_0] : memref<128x768xbf16, #tpu.memory_space<vmem>>, vector<128x768xbf16>
    %c0_1 = arith.constant 0 : index
    %c0_2 = arith.constant 0 : index
    %1 = vector.load %arg2[%c0_1, %c0_2] : memref<768x512xbf16, #tpu.memory_space<vmem>>, vector<768x512xbf16>
    %cst = arith.constant dense<0.000000e+00> : vector<128x512xf32>
    %2 = tpu.matmul %0, %1, %cst {dimension_numbers = #tpu.dot_dimension_numbers<[1], [0], [0], [1], [0, 0, 1, 1], [], []>} : vector<128x768xbf16>, vector<768x512xbf16>, vector<128x512xf32> -> vector<128x512xf32>
    %c0_3 = arith.constant 0 : index
    %c0_4 = arith.constant 0 : index
    %3 = vector.load %arg3[%c0_3, %c0_4] : memref<1x512xf32, #tpu.memory_space<vmem>>, vector<1x512xf32>
    %4 = vector.broadcast %3 : vector<1x512xf32> to vector<128x512xf32>
    %5 = arith.addf %2, %4 : vector<128x512xf32>
    %cst_5 = arith.constant 0.000000e+00 : f32
    %6 = vector.broadcast %cst_5 : f32 to vector<128x512xf32>
    %7 = arith.maximumf %5, %6 : vector<128x512xf32>
    %c0_6 = arith.constant 0 : index
    %c0_7 = arith.constant 0 : index
    %8 = vector.load %arg4[%c0_6, %c0_7] : memref<1x512xf32, #tpu.memory_space<vmem>>, vector<1x512xf32>
    %9 = vector.broadcast %8 : vector<1x512xf32> to vector<128x512xf32>
    %10 = arith.mulf %7, %9 : vector<128x512xf32>
    %cst_8 = arith.constant dense<0.000000e+00> : vector<128xf32>
    %11 = vector.multi_reduction <add>, %10, %cst_8 [1] : vector<128x512xf32> to vector<128xf32>
    %12 = vector.shape_cast %11 : vector<128xf32> to vector<128x1xf32>
    %c0_9 = arith.constant 0 : index
    %c0_10 = arith.constant 0 : index
    %13 = vector.load %arg5[%c0_9, %c0_10] : memref<1x1xf32, #tpu.memory_space<vmem>>, vector<1x1xf32>
    %14 = vector.broadcast %13 : vector<1x1xf32> to vector<128x1xf32>
    %15 = arith.addf %12, %14 : vector<128x1xf32>
    %c0_11 = arith.constant 0 : index
    %c0_12 = arith.constant 0 : index
    %16 = vector.load %arg6[%c0_11, %c0_12] : memref<128x1xf32, #tpu.memory_space<vmem>>, vector<128x1xf32>
    tpu.vector_store %arg6[%c0_11, %c0_12], %15 {strides = array<i32>} : memref<128x1xf32, #tpu.memory_space<vmem>>, vector<128x1xf32>,
    return
  }
  func.func @transform_0(%arg0: i32) -> (i32, i32) {
    %c0_i32 = arith.constant 0 : i32
    %c0_i32_0 = arith.constant 0 : i32
    return %arg0, %c0_i32 : i32, i32
  }
  func.func @transform_1(%arg0: i32) -> (i32, i32) {
    %c0_i32 = arith.constant 0 : i32
    %c0_i32_0 = arith.constant 0 : i32
    %c0_i32_1 = arith.constant 0 : i32
    return %c0_i32, %c0_i32_0 : i32, i32
  }
  func.func @transform_2(%arg0: i32) -> (i32, i32) {
    %c0_i32 = arith.constant 0 : i32
    %c0_i32_0 = arith.constant 0 : i32
    %c0_i32_1 = arith.constant 0 : i32
    return %c0_i32, %c0_i32_0 : i32, i32
  }
  func.func @transform_3(%arg0: i32) -> (i32, i32) {
    %c0_i32 = arith.constant 0 : i32
    %c0_i32_0 = arith.constant 0 : i32
    %c0_i32_1 = arith.constant 0 : i32
    return %c0_i32, %c0_i32_0 : i32, i32
  }
  func.func @transform_4(%arg0: i32) -> (i32, i32) {
    %c0_i32 = arith.constant 0 : i32
    %c0_i32_0 = arith.constant 0 : i32
    %c0_i32_1 = arith.constant 0 : i32
    return %c0_i32, %c0_i32_0 : i32, i32
  }
  func.func @transform_5(%arg0: i32) -> (i32, i32) {
    %c0_i32 = arith.constant 0 : i32
    %c0_i32_0 = arith.constant 0 : i32
    return %arg0, %c0_i32 : i32, i32
  }
}

</mosaic_0001>

<bundles_post_ra>
// kernel: tpu_custom_call.1
= control target key start
LH: loop header
LB: loop body
LE: loop exit
PB: predicated region body
PF: predicated region fallthrough
CT: control target
= control target key end

     0   :  { %s3856_s0 = inlined_call_operand.hbm [shape: bf16[128,768], index: 0, kind: input, shape index: {}]   ;;  %s3857_s1 = inlined_call_operand.hbm [shape: bf16[768,512], index: 1, kind: input, shape index: {}]   ;;  %s3858_s2 = inlined_call_operand.vmem [shape: f32[1,512], index: 2, kind: input, shape index: {}]   ;;  %s3859_s3 = inlined_call_operand.hbm [shape: f32[1,512], index: 3, kind: input, shape index: {}]   ;;  %s3860_s4 = inlined_call_operand.<no memory space> [shape: f32[1,1], index: 4, kind: input, shape index: {}]   ;;  %s3861_s5 = inlined_call_operand.vmem [shape: f32[128,1], index: 5, kind: output, shape index: {}]  }
   0x1   :  { %v10_v0 = vstv %s3860_s4 }
   0x2   :  { %11 = vst [vmem:[#allocation2] sm:$0x1] %v10_v0 }
   0x3   :  { %12 = vsyncpa [#allocation4], 0 }
   0x4   :  { %13 = vsyncpa [#allocation6], 0  ;;  %s3150_s20 = smov [#allocation5]  }
   0x5   :  { %s31_s21 = sshll.u32 %s3150_s20, 4  ;;  %s32_s21 = int_to_ptr.vmem [resolvable:$true] %s31_s21 }
   0x6   :  { %s3094_s22 = scalar_lea.vmem %s32_s21, 24576  ;;  %p3099_p1 = scmp.lt.s32.totalorder %s32_s21, %s32_s21 }
   0x7   :  { %p3095_p0 = scmp.ne.s32.totalorder %s32_s21, %s3094_s22  ;;  %p3100_p2 = scmp.lt.s32.totalorder %s3094_s22, %s3094_s22 }
   0x9   :  { %p3101_p3 = por %p3100_p2, %p3099_p1 }
   0xb   :  { %p3102_p4 = pnand %p3101_p3, %p3095_p0 }
   0xd   :  { %3105 = shalt.err (!%p3102_p4)
}
   0xe   :  { %s3151_s23 = smov 256   ;;  %s3152_s24 = smov 16  }
   0xf   :  { %37 = dma.hbm_to_vmem [thread:$0]  %s3857_s1, 24576, %s32_s21, [#allocation6], %s3151_s23, %s3151_s23, %s3152_s24  }
  0x10   :  { %s3153_s4 = smov [#allocation3]  }
  0x11   :  { %s19_s27 = sshll.u32 %s3153_s4, 4  ;;  %s20_s27 = int_to_ptr.vmem [resolvable:$true] %s19_s27 }
  0x12   :  { %s3114_s28 = scalar_lea.vmem %s20_s27, 6144  ;;  %p3119_p6 = scmp.lt.s32.totalorder %s20_s27, %s20_s27 }
  0x13   :  { %p3115_p5 = scmp.ne.s32.totalorder %s20_s27, %s3114_s28  ;;  %p3120_p7 = scmp.lt.s32.totalorder %s3114_s28, %s3114_s28 }
  0x15   :  { %p3121_p8 = por %p3120_p7, %p3119_p6 }
  0x17   :  { %p3122_p9 = pnand %p3121_p8, %p3115_p5 }
  0x19   :  { %3125 = shalt.err (!%p3122_p9)
}
  0x1a   :  { %s3154_s29 = smov 384   ;;  %s3155_s30 = smov 24  }
  0x1b   :  { %25 = dma.hbm_to_vmem [thread:$0]  %s3856_s0, 6144, %s20_s27, [#allocation4], %s3154_s29, %s3154_s29, %s3155_s30  }
  0x1c   :  { %s3156_s8 = smov [#allocation7]  }
  0x1d   :  { %s46_s9 = sshll.u32 %s3156_s8, 4  ;;  %s47_s9 = int_to_ptr.vmem [resolvable:$true] %s46_s9 }
  0x1e   :  { %s3134_s1 = scalar_lea.vmem %s47_s9, 64  ;;  %p3139_p11 = scmp.lt.s32.totalorder %s47_s9, %s47_s9 }
  0x1f   :  { %p3135_p10 = scmp.ne.s32.totalorder %s47_s9, %s3134_s1  ;;  %p3140_p12 = scmp.lt.s32.totalorder %s3134_s1, %s3134_s1 }
  0x21   :  { %p3141_p13 = por %p3140_p12, %p3139_p11 }
  0x23   :  { %p3142_p0 = pnand %p3141_p13, %p3135_p10 }
  0x25   :  { %3145 = shalt.err (!%p3142_p0)
}
  0x26   :  { %49 = dma.hbm_to_vmem [thread:$0]  %s3859_s3, 64, %s47_s9, [#allocation6]  }
  0x27   :  { %3146 = dma.done.wait [#allocation4], 6144  }
  0x28   :  { %3147 = vsyncadd [#allocation4], 4294961152 }
  0x29   :  { %3148 = dma.done.wait [#allocation6], 24640  }
  0x2a   :  { %3149 = vsyncadd [#allocation6], 4294942656  ;;  %v2725_v1 = vld [vmem:[#allocation5 + $0xe4] ss:$16 sps:$4 sm:$0xff]   ;;  %v2729_v3 = vld [vmem:[#allocation5 + $0xe0] ss:$16 sps:$4 sm:$0xff]  }
  0x2b   :  { %v2727_v2 = vld [vmem:[#allocation5 + $0x2e4] ss:$16 sps:$4 sm:$0xff]   ;;  %1523 = vmatprep.subr.bf16.mxu0 %v2725_v1  ;;  %v2730_v4 = vld [vmem:[#allocation5 + $0x2e0] ss:$16 sps:$4 sm:$0xff]   ;;  %vm2454_vm0 = vcmask 7168  }
  0x2c   :  { %1636 = vmatprep.subr.bf16.mxu1 %v2727_v2  ;;  %v2731_v5 = vld [vmem:[#allocation5 + $0xc4] ss:$16 sps:$4 sm:$0xff]   ;;  %1524 = vmatpush1.bf16.msra.mxu0 %v2729_v3  ;;  %v2735_v7 = vld [vmem:[#allocation5 + $0xc0] ss:$16 sps:$4 sm:$0xff]  }
  0x2d   :  { %1637 = vmatpush1.bf16.msra.mxu1 %v2730_v4  ;;  %v2733_v6 = vld [vmem:[#allocation5 + $0x2c4] ss:$16 sps:$4 sm:$0xff]   ;;  %1525 = vmatprep.subr.bf16.mxu0 %v2731_v5  ;;  %v2736_v8 = vld [vmem:[#allocation5 + $0x2c0] ss:$16 sps:$4 sm:$0xff]   ;;  %v2832_v4 = vld [vmem:[#allocation5 + $0xec] ss:$16 sps:$4 sm:$0xff]  }
  0x2e   :  { %1638 = vmatprep.subr.bf16.mxu1 %v2733_v6  ;;  %v2737_v9 = vld [vmem:[#allocation5 + $0xa4] ss:$16 sps:$4 sm:$0xff]   ;;  %v2741_v11 = vld [vmem:[#allocation5 + $0xa0] ss:$16 sps:$4 sm:$0xff]  }
  0x2f   :  { %v2739_v10 = vld [vmem:[#allocation5 + $0x2a4] ss:$16 sps:$4 sm:$0xff]   ;;  %v2742_v12 = vld [vmem:[#allocation5 + $0x2a0] ss:$16 sps:$4 sm:$0xff]  }
  0x30   :  { %1526 = vmatpush1.bf16.msra.mxu0 %v2735_v7  ;;  %v2743_v13 = vld [vmem:[#allocation5 + $0x84] ss:$16 sps:$4 sm:$0xff]   ;;  %v2747_v15 = vld [vmem:[#allocation5 + $0x80] ss:$16 sps:$4 sm:$0xff]  }
  0x31   :  { %1639 = vmatpush1.bf16.msra.mxu1 %v2736_v8  ;;  %1527 = vmatprep.subr.bf16.mxu0 %v2737_v9  ;;  %v2745_v14 = vld [vmem:[#allocation5 + $0x284] ss:$16 sps:$4 sm:$0xff]   ;;  %v2748_v16 = vld [vmem:[#allocation5 + $0x280] ss:$16 sps:$4 sm:$0xff]   ;;  %v2830_v8 = vld [vmem:[#allocation5 + $0xe8] ss:$16 sps:$4 sm:$0xff]  }
  0x32   :  { %1640 = vmatprep.subr.bf16.mxu1 %v2739_v10  ;;  %v2749_v17 = vld [vmem:[#allocation5 + $0x64] ss:$16 sps:$4 sm:$0xff]   ;;  %v2753_v19 = vld [vmem:[#allocation5 + $0x60] ss:$16 sps:$4 sm:$0xff]   ;;  %v2838_v10 = vld [vmem:[#allocation5 + $0xcc] ss:$16 sps:$4 sm:$0xff]  }
  0x33   :  { %v2751_v18 = vld [vmem:[#allocation5 + $0x264] ss:$16 sps:$4 sm:$0xff]   ;;  %v2754_v20 = vld [vmem:[#allocation5 + $0x260] ss:$16 sps:$4 sm:$0xff]  }
  0x34   :  { %1528 = vmatpush1.bf16.msra.mxu0 %v2741_v11  ;;  %v2755_v21 = vld [vmem:[#allocation5 + $0x44] ss:$16 sps:$4 sm:$0xff]   ;;  %v2759_v23 = vld [vmem:[#allocation5 + $0x40] ss:$16 sps:$4 sm:$0xff]  }
  0x35   :  { %1641 = vmatpush1.bf16.msra.mxu1 %v2742_v12  ;;  %1529 = vmatprep.subr.bf16.mxu0 %v2743_v13  ;;  %v2757_v22 = vld [vmem:[#allocation5 + $0x244] ss:$16 sps:$4 sm:$0xff]   ;;  %v2760_v24 = vld [vmem:[#allocation5 + $0x240] ss:$16 sps:$4 sm:$0xff]  }
  0x36   :  { %1642 = vmatprep.subr.bf16.mxu1 %v2745_v14  ;;  %v2761_v25 = vld [vmem:[#allocation5 + $0x24] ss:$16 sps:$4 sm:$0xff]   ;;  %v2765_v27 = vld [vmem:[#allocation5 + $0x20] ss:$16 sps:$4 sm:$0xff]   ;;  %v2836_v14 = vld [vmem:[#allocation5 + $0xc8] ss:$16 sps:$4 sm:$0xff]  }
  0x37   :  { %v2763_v26 = vld [vmem:[#allocation5 + $0x224] ss:$16 sps:$4 sm:$0xff]   ;;  %v2766_v28 = vld [vmem:[#allocation5 + $0x220] ss:$16 sps:$4 sm:$0xff]  }
  0x38   :  { %1530 = vmatpush1.bf16.msra.mxu0 %v2747_v15  ;;  %v2767_v29 = vld [vmem:[#allocation5 + $0x4] ss:$16 sps:$4 sm:$0xff]   ;;  %v2771_v31 = vld [vmem:[#allocation5] ss:$16 sps:$4 sm:$0xff]  }
  0x39   :  { %1643 = vmatpush1.bf16.msra.mxu1 %v2748_v16  ;;  %1531 = vmatprep.subr.bf16.mxu0 %v2749_v17  ;;  %v2769_v30 = vld [vmem:[#allocation5 + $0x204] ss:$16 sps:$4 sm:$0xff]   ;;  %v2772_v32 = vld [vmem:[#allocation5 + $0x200] ss:$16 sps:$4 sm:$0xff]   ;;  %v2850_v16 = vld [vmem:[#allocation5 + $0xac] ss:$16 sps:$4 sm:$0xff]  }
  0x3a   :  { %1644 = vmatprep.subr.bf16.mxu1 %v2751_v18  ;;  %v2773_v33 = vld [vmem:[#allocation5 + $0x1e4] ss:$16 sps:$4 sm:$0xff]   ;;  %v2777_v35 = vld [vmem:[#allocation5 + $0x1e0] ss:$16 sps:$4 sm:$0xff]  }
  0x3b   :  { %v2775_v34 = vld [vmem:[#allocation5 + $0x3e4] ss:$16 sps:$4 sm:$0xff]   ;;  %v2778_v36 = vld [vmem:[#allocation5 + $0x3e0] ss:$16 sps:$4 sm:$0xff]  }
  0x3c   :  { %1532 = vmatpush1.bf16.msra.mxu0 %v2753_v19  ;;  %v2779_v37 = vld [vmem:[#allocation5 + $0x1c4] ss:$16 sps:$4 sm:$0xff]   ;;  %v2783_v39 = vld [vmem:[#allocation5 + $0x1c0] ss:$16 sps:$4 sm:$0xff]  }
  0x3d   :  { %1645 = vmatpush1.bf16.msra.mxu1 %v2754_v20  ;;  %1533 = vmatprep.subr.bf16.mxu0 %v2755_v21  ;;  %v2781_v38 = vld [vmem:[#allocation5 + $0x3c4] ss:$16 sps:$4 sm:$0xff]   ;;  %v2784_v40 = vld [vmem:[#allocation5 + $0x3c0] ss:$16 sps:$4 sm:$0xff]   ;;  %v2848_v20 = vld [vmem:[#allocation5 + $0xa8] ss:$16 sps:$4 sm:$0xff]  }
  0x3e   :  { %1646 = vmatprep.subr.bf16.mxu1 %v2757_v22  ;;  %v2785_v41 = vld [vmem:[#allocation5 + $0x1a4] ss:$16 sps:$4 sm:$0xff]   ;;  %v2789_v43 = vld [vmem:[#allocation5 + $0x1a0] ss:$16 sps:$4 sm:$0xff]   ;;  %v2856_v22 = vld [vmem:[#allocation5 + $0x8c] ss:$16 sps:$4 sm:$0xff]  }
  0x3f   :  { %v2787_v42 = vld [vmem:[#allocation5 + $0x3a4] ss:$16 sps:$4 sm:$0xff]   ;;  %v2790_v44 = vld [vmem:[#allocation5 + $0x3a0] ss:$16 sps:$4 sm:$0xff]  }
  0x40   :  { %1534 = vmatpush1.bf16.msra.mxu0 %v2759_v23  ;;  %v2791_v45 = vld [vmem:[#allocation5 + $0x184] ss:$16 sps:$4 sm:$0xff]   ;;  %v2795_v47 = vld [vmem:[#allocation5 + $0x180] ss:$16 sps:$4 sm:$0xff]  }
  0x41   :  { %1647 = vmatpush1.bf16.msra.mxu1 %v2760_v24  ;;  %1535 = vmatprep.subr.bf16.mxu0 %v2761_v25  ;;  %v2793_v46 = vld [vmem:[#allocation5 + $0x384] ss:$16 sps:$4 sm:$0xff]   ;;  %v2796_v48 = vld [vmem:[#allocation5 + $0x380] ss:$16 sps:$4 sm:$0xff]  }
  0x42   :  { %1648 = vmatprep.subr.bf16.mxu1 %v2763_v26  ;;  %v2797_v49 = vld [vmem:[#allocation5 + $0x164] ss:$16 sps:$4 sm:$0xff]   ;;  %v2801_v53 = vld [vmem:[#allocation5 + $0x160] ss:$16 sps:$4 sm:$0xff]   ;;  %v2854_v26 = vld [vmem:[#allocation5 + $0x88] ss:$16 sps:$4 sm:$0xff]  }
  0x43   :  { %v3199_v50 = vld [vmem:[#allocation3 + $0x4] ss:$24 sps:$4 sm:$0xff]   ;;  %v2802_v54 = vld [vmem:[#allocation5 + $0x360] ss:$16 sps:$4 sm:$0xff]   ;;  %v3206_v11 = vld [vmem:[#allocation3 + $0x34] ss:$24 sps:$4 sm:$0xff]  }
  0x44   :  { %1536 = vmatpush1.bf16.msra.mxu0 %v2765_v27  ;;  %v2799_v51 = vld [vmem:[#allocation5 + $0x364] ss:$16 sps:$4 sm:$0xff]   ;;  %1555 = vmatprep.mubr.bf16.mxu0 %v3199_v50  ;;  %v2807_v57 = vld [vmem:[#allocation5 + $0x140] ss:$16 sps:$4 sm:$0xff]  }
  0x45   :  { %1649 = vmatpush1.bf16.msra.mxu1 %v2766_v28  ;;  %1537 = vmatprep.subr.bf16.mxu0 %v2767_v29  ;;  %v2826_v52 = vld [vmem:[#allocation3 + $0xc] ss:$24 sps:$4 sm:$0xff]   ;;  %v2808_v58 = vld [vmem:[#allocation5 + $0x340] ss:$16 sps:$4 sm:$0xff]   ;;  %v3208_v12 = vld [vmem:[#allocation3 + $0x3c] ss:$24 sps:$4 sm:$0xff]  }
  0x46   :  { %1650 = vmatprep.subr.bf16.mxu1 %v2769_v30  ;;  %1668 = vmatprep.mubr.bf16.mxu1 %v2826_v52  ;;  %v2803_v55 = vld [vmem:[#allocation5 + $0x144] ss:$16 sps:$4 sm:$0xff]   ;;  %v2813_v61 = vld [vmem:[#allocation5 + $0x120] ss:$16 sps:$4 sm:$0xff]   ;;  %v2868_v28 = vld [vmem:[#allocation5 + $0x6c] ss:$16 sps:$4 sm:$0xff]  }
  0x47   :  { %v2805_v56 = vld [vmem:[#allocation5 + $0x344] ss:$16 sps:$4 sm:$0xff]   ;;  %v2814_v62 = vld [vmem:[#allocation5 + $0x320] ss:$16 sps:$4 sm:$0xff]  }
  0x48   :  { %1538 = vmatpush1.bf16.msra.mxu0 %v2771_v31  ;;  %v2809_v59 = vld [vmem:[#allocation5 + $0x124] ss:$16 sps:$4 sm:$0xff]   ;;  %v2819_v1 = vld [vmem:[#allocation5 + $0x100] ss:$16 sps:$4 sm:$0xff]  }
  0x49   :  { %1651 = vmatpush1.bf16.msra.mxu1 %v2772_v32  ;;  %1539 = vmatprep.subr.bf16.mxu0 %v2773_v33  ;;  %v2811_v60 = vld [vmem:[#allocation5 + $0x324] ss:$16 sps:$4 sm:$0xff]   ;;  %v2820_v2 = vld [vmem:[#allocation5 + $0x300] ss:$16 sps:$4 sm:$0xff]   ;;  %v2866_v32 = vld [vmem:[#allocation5 + $0x68] ss:$16 sps:$4 sm:$0xff]  }
  0x4a   :  { %1652 = vmatprep.subr.bf16.mxu1 %v2775_v34  ;;  %v2815_v63 = vld [vmem:[#allocation5 + $0x104] ss:$16 sps:$4 sm:$0xff]   ;;  %v3202_v5 = vld [vmem:[#allocation3] ss:$24 sps:$4 sm:$0xff]   ;;  %v3214_v17 = vld [vmem:[#allocation3 + $0x30] ss:$24 sps:$4 sm:$0xff]  }
  0x4b   :  { %v2817_v0 = vld [vmem:[#allocation5 + $0x304] ss:$16 sps:$4 sm:$0xff]   ;;  %v3204_v6 = vld [vmem:[#allocation3 + $0x8] ss:$24 sps:$4 sm:$0xff]   ;;  %v3216_v18 = vld [vmem:[#allocation3 + $0x38] ss:$24 sps:$4 sm:$0xff]  }
  0x4c   :  { %1540 = vmatpush2.bf16.msra.mxu0 %v2777_v35  ;;  %v2829_v3 = vld [vmem:[#allocation5 + $0x4e4] ss:$16 sps:$4 sm:$0xff]   ;;  %v2827_v7 = vld [vmem:[#allocation5 + $0x4e0] ss:$16 sps:$4 sm:$0xff]   ;;  %v2874_v34 = vld [vmem:[#allocation5 + $0x4c] ss:$16 sps:$4 sm:$0xff]  }
  0x4d   :  { %1653 = vmatpush2.bf16.msra.mxu1 %v2778_v36  ;;  %1541 = vmatprep.subr.bf16.mxu0 %v2779_v37  ;;  %v2835_v9 = vld [vmem:[#allocation5 + $0x4c4] ss:$16 sps:$4 sm:$0xff]   ;;  %v2833_v13 = vld [vmem:[#allocation5 + $0x4c0] ss:$16 sps:$4 sm:$0xff]  }
  0x4e   :  { %1654 = vmatprep.subr.bf16.mxu1 %v2781_v38  ;;  %v2847_v15 = vld [vmem:[#allocation5 + $0x4a4] ss:$16 sps:$4 sm:$0xff]   ;;  %v2845_v19 = vld [vmem:[#allocation5 + $0x4a0] ss:$16 sps:$4 sm:$0xff]   ;;  %v2872_v38 = vld [vmem:[#allocation5 + $0x48] ss:$16 sps:$4 sm:$0xff]  }
  0x4f   :  { %v2853_v21 = vld [vmem:[#allocation5 + $0x484] ss:$16 sps:$4 sm:$0xff]   ;;  %v2851_v25 = vld [vmem:[#allocation5 + $0x480] ss:$16 sps:$4 sm:$0xff]  }
  0x50   :  { %1542 = vmatpush2.bf16.msra.mxu0 %v2783_v39  ;;  %v3218_v23 = vld [vmem:[#allocation3 + $0x64] ss:$24 sps:$4 sm:$0xff]   ;;  %v3226_v29 = vld [vmem:[#allocation3 + $0x60] ss:$24 sps:$4 sm:$0xff]   ;;  %v3230_v35 = vld [vmem:[#allocation3 + $0x94] ss:$24 sps:$4 sm:$0xff]  }
  0x51   :  { %1655 = vmatpush2.bf16.msra.mxu1 %v2784_v40  ;;  %1543 = vmatprep.subr.bf16.mxu0 %v2785_v41  ;;  %v3220_v24 = vld [vmem:[#allocation3 + $0x6c] ss:$24 sps:$4 sm:$0xff]   ;;  %v3228_v30 = vld [vmem:[#allocation3 + $0x68] ss:$24 sps:$4 sm:$0xff]   ;;  %v3232_v36 = vld [vmem:[#allocation3 + $0x9c] ss:$24 sps:$4 sm:$0xff]  }
  0x52   :  { %1656 = vmatprep.subr.bf16.mxu1 %v2787_v42  ;;  %v2865_v27 = vld [vmem:[#allocation5 + $0x464] ss:$16 sps:$4 sm:$0xff]   ;;  %v2863_v31 = vld [vmem:[#allocation5 + $0x460] ss:$16 sps:$4 sm:$0xff]   ;;  %v2886_v40 = vld [vmem:[#allocation5 + $0x2c] ss:$16 sps:$4 sm:$0xff]  }
  0x53   :  { %v2871_v33 = vld [vmem:[#allocation5 + $0x444] ss:$16 sps:$4 sm:$0xff]   ;;  %v2869_v37 = vld [vmem:[#allocation5 + $0x440] ss:$16 sps:$4 sm:$0xff]  }
  0x54   :  { %1544 = vmatpush2.bf16.msra.mxu0 %v2789_v43  ;;  %v2883_v39 = vld [vmem:[#allocation5 + $0x424] ss:$16 sps:$4 sm:$0xff]   ;;  %v3238_v41 = vld [vmem:[#allocation3 + $0x90] ss:$24 sps:$4 sm:$0xff]  }
  0x55   :  { %1657 = vmatpush2.bf16.msra.mxu1 %v2790_v44  ;;  %1545 = vmatprep.subr.bf16.mxu0 %v2791_v45  ;;  %v3240_v42 = vld [vmem:[#allocation3 + $0x98] ss:$24 sps:$4 sm:$0xff]   ;;  %v2889_v45 = vld [vmem:[#allocation5 + $0x404] ss:$16 sps:$4 sm:$0xff]  }
  0x56   :  { %1658 = vmatprep.subr.bf16.mxu1 %v2793_v46  ;;  %v2881_v43 = vld [vmem:[#allocation5 + $0x420] ss:$16 sps:$4 sm:$0xff]   ;;  %v2884_v44 = vld [vmem:[#allocation5 + $0x28] ss:$16 sps:$4 sm:$0xff]   ;;  %v2892_v46 = vld [vmem:[#allocation5 + $0xc] ss:$16 sps:$4 sm:$0xff]  }
  0x57   :  { %v2901_v52 = vld [vmem:[#allocation5 + $0x5e4] ss:$16 sps:$4 sm:$0xff]  }
  0x58   :  { %1546 = vmatpush2.bf16.msra.mxu0 %v2795_v47  ;;  %v3242_v47 = vld [vmem:[#allocation3 + $0xc4] ss:$24 sps:$4 sm:$0xff]  }
  0x59   :  { %1659 = vmatpush2.bf16.msra.mxu1 %v2796_v48  ;;  %1547 = vmatprep.subr.bf16.mxu0 %v2797_v49  ;;  %v3244_v48 = vld [vmem:[#allocation3 + $0xcc] ss:$24 sps:$4 sm:$0xff]   ;;  %v2887_v49 = vld [vmem:[#allocation5 + $0x400] ss:$16 sps:$4 sm:$0xff]  }
  0x5a   :  { %1660 = vmatprep.subr.bf16.mxu1 %v2799_v51  ;;  %v2890_v51 = vld [vmem:[#allocation5 + $0x8] ss:$16 sps:$4 sm:$0xff]  }
  0x5c   :  { %1548 = vmatpush2.bf16.msra.mxu0 %v2801_v53  ;;  %v2904_v53 = vld [vmem:[#allocation5 + $0x1ec] ss:$16 sps:$4 sm:$0xff]  }
  0x5d   :  { %1661 = vmatpush2.bf16.msra.mxu1 %v2802_v54  ;;  %1549 = vmatprep.subr.bf16.mxu0 %v2803_v55  ;;  %v3250_v54 = vld [vmem:[#allocation3 + $0xc0] ss:$24 sps:$4 sm:$0xff]  }
  0x5e   :  { %1662 = vmatprep.subr.bf16.mxu1 %v2805_v56  ;;  %v3252_v55 = vld [vmem:[#allocation3 + $0xc8] ss:$24 sps:$4 sm:$0xff]  }
  0x5f   :  { %v2899_v56 = vld [vmem:[#allocation5 + $0x5e0] ss:$16 sps:$4 sm:$0xff]  }
  0x60   :  { %1550 = vmatpush2.bf16.msra.mxu0 %v2807_v57  ;;  %v2902_v57 = vld [vmem:[#allocation5 + $0x1e8] ss:$16 sps:$4 sm:$0xff]  }
  0x61   :  { %1663 = vmatpush2.bf16.msra.mxu1 %v2808_v58  ;;  %1551 = vmatprep.subr.bf16.mxu0 %v2809_v59  ;;  %v2907_v58 = vld [vmem:[#allocation5 + $0x5c4] ss:$16 sps:$4 sm:$0xff]   ;;  %v2910_v59 = vld [vmem:[#allocation5 + $0x1cc] ss:$16 sps:$4 sm:$0xff]  }
  0x62   :  { %1664 = vmatprep.subr.bf16.mxu1 %v2811_v60  ;;  %v3254_v60 = vld [vmem:[#allocation3 + $0xf4] ss:$24 sps:$4 sm:$0xff]  }
  0x64   :  { %1552 = vmatpush2.bf16.msra.mxu0 %v2813_v61  ;;  %v3256_v61 = vld [vmem:[#allocation3 + $0xfc] ss:$24 sps:$4 sm:$0xff]  }
  0x65   :  { %1665 = vmatpush2.bf16.msra.mxu1 %v2814_v62  ;;  %1553 = vmatprep.subr.bf16.mxu0 %v2815_v63  ;;  %v2905_v62 = vld [vmem:[#allocation5 + $0x5c0] ss:$16 sps:$4 sm:$0xff]   ;;  %v2908_v63 = vld [vmem:[#allocation5 + $0x1c8] ss:$16 sps:$4 sm:$0xff]  }
  0x66   :  { %1666 = vmatprep.subr.bf16.mxu1 %v2817_v0  ;;  %v2919_v0 = vld [vmem:[#allocation5 + $0x5a4] ss:$16 sps:$4 sm:$0xff]  }
  0x68   :  { %1554 = vmatpush2.bf16.msra.mxu0 %v2819_v1  ;;  %v2922_v1 = vld [vmem:[#allocation5 + $0x1ac] ss:$16 sps:$4 sm:$0xff]  }
  0x69   :  { %1667 = vmatpush2.bf16.msra.mxu1 %v2820_v2  ;;  %1749 = vmatprep.subr.bf16.mxu0 %v2829_v3  ;;  %v3262_v2 = vld [vmem:[#allocation3 + $0xf0] ss:$24 sps:$4 sm:$0xff]  }
  0x6a   :  { %1862 = vmatprep.subr.bf16.mxu1 %v2832_v4  ;;  %v3264_v3 = vld [vmem:[#allocation3 + $0xf8] ss:$24 sps:$4 sm:$0xff]  }
  0x6b   :  { %1556 = vmatmul.mubr.bf16.vlgmr.msra.gmra.mxu0 %v3202_v5  ;;  %v2917_v4 = vld [vmem:[#allocation5 + $0x5a0] ss:$16 sps:$4 sm:$0xff]  }
  0x6c   :  { %1669 = vmatmul.mubr.bf16.vlgmr.msra.gmra.mxu1 %v3204_v6  ;;  %1750 = vmatpush1.bf16.msra.mxu0 %v2827_v7  ;;  %v2920_v7 = vld [vmem:[#allocation5 + $0x1a8] ss:$16 sps:$4 sm:$0xff]  }
  0x6d   :  { %1863 = vmatpush1.bf16.msra.mxu1 %v2830_v8  ;;  %1751 = vmatprep.subr.bf16.mxu0 %v2835_v9  ;;  %v2925_v8 = vld [vmem:[#allocation5 + $0x584] ss:$16 sps:$4 sm:$0xff]   ;;  %v2928_v9 = vld [vmem:[#allocation5 + $0x18c] ss:$16 sps:$4 sm:$0xff]  }
  0x6e   :  { %1864 = vmatprep.subr.bf16.mxu1 %v2838_v10  ;;  %1565 = vmatprep.mubr.bf16.mxu0 %v3206_v11  ;;  %v3266_v10 = vld [vmem:[#allocation3 + $0x124] ss:$24 sps:$4 sm:$0xff]  }
  0x6f   :  { %1678 = vmatprep.mubr.bf16.mxu1 %v3208_v12 }
  0x70   :  { %1752 = vmatpush1.bf16.msra.mxu0 %v2833_v13  ;;  %v3268_v13 = vld [vmem:[#allocation3 + $0x12c] ss:$24 sps:$4 sm:$0xff]  }
  0x71   :  { %1865 = vmatpush1.bf16.msra.mxu1 %v2836_v14  ;;  %1753 = vmatprep.subr.bf16.mxu0 %v2847_v15  ;;  %v2923_v14 = vld [vmem:[#allocation5 + $0x580] ss:$16 sps:$4 sm:$0xff]   ;;  %v2926_v15 = vld [vmem:[#allocation5 + $0x188] ss:$16 sps:$4 sm:$0xff]  }
  0x72   :  { %1866 = vmatprep.subr.bf16.mxu1 %v2850_v16  ;;  %v2937_v16 = vld [vmem:[#allocation5 + $0x564] ss:$16 sps:$4 sm:$0xff]  }
  0x73   :  { %1566 = vmatmul.mubr.bf16.gmra.mxu0 %v3214_v17 }
  0x74   :  { %1679 = vmatmul.mubr.bf16.gmra.mxu1 %v3216_v18  ;;  %1754 = vmatpush1.bf16.msra.mxu0 %v2845_v19  ;;  %v2940_v19 = vld [vmem:[#allocation5 + $0x16c] ss:$16 sps:$4 sm:$0xff]  }
  0x75   :  { %1867 = vmatpush1.bf16.msra.mxu1 %v2848_v20  ;;  %1755 = vmatprep.subr.bf16.mxu0 %v2853_v21  ;;  %v3274_v20 = vld [vmem:[#allocation3 + $0x120] ss:$24 sps:$4 sm:$0xff]  }
  0x76   :  { %1868 = vmatprep.subr.bf16.mxu1 %v2856_v22  ;;  %1575 = vmatprep.mubr.bf16.mxu0 %v3218_v23  ;;  %v3276_v21 = vld [vmem:[#allocation3 + $0x128] ss:$24 sps:$4 sm:$0xff]  }
  0x77   :  { %1688 = vmatprep.mubr.bf16.mxu1 %v3220_v24  ;;  %v2935_v22 = vld [vmem:[#allocation5 + $0x560] ss:$16 sps:$4 sm:$0xff]  }
  0x78   :  { %1756 = vmatpush1.bf16.msra.mxu0 %v2851_v25  ;;  %v2938_v25 = vld [vmem:[#allocation5 + $0x168] ss:$16 sps:$4 sm:$0xff]  }
  0x79   :  { %1869 = vmatpush1.bf16.msra.mxu1 %v2854_v26  ;;  %1757 = vmatprep.subr.bf16.mxu0 %v2865_v27  ;;  %v2943_v26 = vld [vmem:[#allocation5 + $0x544] ss:$16 sps:$4 sm:$0xff]   ;;  %v2946_v27 = vld [vmem:[#allocation5 + $0x14c] ss:$16 sps:$4 sm:$0xff]  }
  0x7a   :  { %1870 = vmatprep.subr.bf16.mxu1 %v2868_v28  ;;  %v3278_v28 = vld [vmem:[#allocation3 + $0x154] ss:$24 sps:$4 sm:$0xff]  }
  0x7b   :  { %1576 = vmatmul.mubr.bf16.gmra.mxu0 %v3226_v29 }
  0x7c   :  { %1689 = vmatmul.mubr.bf16.gmra.mxu1 %v3228_v30  ;;  %1758 = vmatpush1.bf16.msra.mxu0 %v2863_v31  ;;  %v3280_v31 = vld [vmem:[#allocation3 + $0x15c] ss:$24 sps:$4 sm:$0xff]  }
  0x7d   :  { %1871 = vmatpush1.bf16.msra.mxu1 %v2866_v32  ;;  %1759 = vmatprep.subr.bf16.mxu0 %v2871_v33  ;;  %v2941_v32 = vld [vmem:[#allocation5 + $0x540] ss:$16 sps:$4 sm:$0xff]   ;;  %v2944_v33 = vld [vmem:[#allocation5 + $0x148] ss:$16 sps:$4 sm:$0xff]  }
  0x7e   :  { %1872 = vmatprep.subr.bf16.mxu1 %v2874_v34  ;;  %1585 = vmatprep.mubr.bf16.mxu0 %v3230_v35  ;;  %v2955_v34 = vld [vmem:[#allocation5 + $0x524] ss:$16 sps:$4 sm:$0xff]  }
  0x7f   :  { %1698 = vmatprep.mubr.bf16.mxu1 %v3232_v36 }
  0x80   :  { %1760 = vmatpush1.bf16.msra.mxu0 %v2869_v37  ;;  %v2958_v37 = vld [vmem:[#allocation5 + $0x12c] ss:$16 sps:$4 sm:$0xff]  }
  0x81   :  { %1873 = vmatpush1.bf16.msra.mxu1 %v2872_v38  ;;  %1761 = vmatprep.subr.bf16.mxu0 %v2883_v39  ;;  %v3286_v38 = vld [vmem:[#allocation3 + $0x150] ss:$24 sps:$4 sm:$0xff]  }
  0x82   :  { %1874 = vmatprep.subr.bf16.mxu1 %v2886_v40  ;;  %v3288_v39 = vld [vmem:[#allocation3 + $0x158] ss:$24 sps:$4 sm:$0xff]  }
  0x83   :  { %1586 = vmatmul.mubr.bf16.gmra.mxu0 %v3238_v41  ;;  %v2953_v40 = vld [vmem:[#allocation5 + $0x520] ss:$16 sps:$4 sm:$0xff]  }
  0x84   :  { %1699 = vmatmul.mubr.bf16.gmra.mxu1 %v3240_v42  ;;  %1762 = vmatpush1.bf16.msra.mxu0 %v2881_v43  ;;  %v2956_v43 = vld [vmem:[#allocation5 + $0x128] ss:$16 sps:$4 sm:$0xff]  }
  0x85   :  { %1875 = vmatpush1.bf16.msra.mxu1 %v2884_v44  ;;  %1763 = vmatprep.subr.bf16.mxu0 %v2889_v45  ;;  %v2961_v44 = vld [vmem:[#allocation5 + $0x504] ss:$16 sps:$4 sm:$0xff]   ;;  %v2964_v45 = vld [vmem:[#allocation5 + $0x10c] ss:$16 sps:$4 sm:$0xff]  }
  0x86   :  { %1876 = vmatprep.subr.bf16.mxu1 %v2892_v46  ;;  %1595 = vmatprep.mubr.bf16.mxu0 %v3242_v47  ;;  %v3290_v46 = vld [vmem:[#allocation3 + $0x14] ss:$24 sps:$4 sm:$0xff]  }
  0x87   :  { %1708 = vmatprep.mubr.bf16.mxu1 %v3244_v48 }
  0x88   :  { %1764 = vmatpush1.bf16.msra.mxu0 %v2887_v49  ;;  %v2959_v49 = vld [vmem:[#allocation5 + $0x500] ss:$16 sps:$4 sm:$0xff]  }
  0x89   :  { %1877 = vmatpush1.bf16.msra.mxu1 %v2890_v51  ;;  %1765 = vmatprep.subr.bf16.mxu0 %v2901_v52  ;;  %v2962_v51 = vld [vmem:[#allocation5 + $0x108] ss:$16 sps:$4 sm:$0xff]   ;;  %v2970_v52 = vld [vmem:[#allocation5 + $0x2ec] ss:$16 sps:$4 sm:$0xff]  }
  0x8a   :  { %1878 = vmatprep.subr.bf16.mxu1 %v2904_v53  ;;  %v2973_v53 = vld [vmem:[#allocation5 + $0x4ec] ss:$16 sps:$4 sm:$0xff]  }
  0x8b   :  { %1596 = vmatmul.mubr.bf16.gmra.mxu0 %v3250_v54 }
  0x8c   :  { %1709 = vmatmul.mubr.bf16.gmra.mxu1 %v3252_v55  ;;  %1766 = vmatpush2.bf16.msra.mxu0 %v2899_v56  ;;  %v3294_v56 = vld [vmem:[#allocation3 + $0x10] ss:$24 sps:$4 sm:$0xff]  }
  0x8d   :  { %1879 = vmatpush2.bf16.msra.mxu1 %v2902_v57  ;;  %1767 = vmatprep.subr.bf16.mxu0 %v2907_v58  ;;  %v2968_v57 = vld [vmem:[#allocation5 + $0x2e8] ss:$16 sps:$4 sm:$0xff]  }
  0x8e   :  { %1880 = vmatprep.subr.bf16.mxu1 %v2910_v59  ;;  %1605 = vmatprep.mubr.bf16.mxu0 %v3254_v60  ;;  %v2971_v58 = vld [vmem:[#allocation5 + $0x4e8] ss:$16 sps:$4 sm:$0xff]   ;;  %v2976_v59 = vld [vmem:[#allocation5 + $0x2cc] ss:$16 sps:$4 sm:$0xff]  }
  0x8f   :  { %1718 = vmatprep.mubr.bf16.mxu1 %v3256_v61 }
  0x90   :  { %1768 = vmatpush2.bf16.msra.mxu0 %v2905_v62  ;;  %v2979_v62 = vld [vmem:[#allocation5 + $0x4cc] ss:$16 sps:$4 sm:$0xff]  }
  0x91   :  { %1881 = vmatpush2.bf16.msra.mxu1 %v2908_v63  ;;  %1769 = vmatprep.subr.bf16.mxu0 %v2919_v0  ;;  %v3298_v63 = vld [vmem:[#allocation3 + $0x44] ss:$24 sps:$4 sm:$0xff]   ;;  %v2974_v0 = vld [vmem:[#allocation5 + $0x2c8] ss:$16 sps:$4 sm:$0xff]  }
  0x92   :  { %1882 = vmatprep.subr.bf16.mxu1 %v2922_v1  ;;  %v2977_v1 = vld [vmem:[#allocation5 + $0x4c8] ss:$16 sps:$4 sm:$0xff]  }
  0x93   :  { %1606 = vmatmul.mubr.bf16.gmra.mxu0 %v3262_v2 }
  0x94   :  { %1719 = vmatmul.mubr.bf16.gmra.mxu1 %v3264_v3  ;;  %1770 = vmatpush2.bf16.msra.mxu0 %v2917_v4  ;;  %v2985_v4 = vld [vmem:[#allocation5 + $0x2ac] ss:$16 sps:$4 sm:$0xff]  }
  0x95   :  { %1883 = vmatpush2.bf16.msra.mxu1 %v2920_v7  ;;  %1771 = vmatprep.subr.bf16.mxu0 %v2925_v8  ;;  %v3304_v7 = vld [vmem:[#allocation3 + $0x40] ss:$24 sps:$4 sm:$0xff]  }
  0x96   :  { %1884 = vmatprep.subr.bf16.mxu1 %v2928_v9  ;;  %1615 = vmatprep.mubr.bf16.mxu0 %v3266_v10  ;;  %v2983_v8 = vld [vmem:[#allocation5 + $0x2a8] ss:$16 sps:$4 sm:$0xff]  }
  0x97   :  { %1728 = vmatprep.mubr.bf16.mxu1 %v3268_v13  ;;  %v2986_v9 = vld [vmem:[#allocation5 + $0x4a8] ss:$16 sps:$4 sm:$0xff]  }
  0x98   :  { %1772 = vmatpush2.bf16.msra.mxu0 %v2923_v14  ;;  %v2991_v14 = vld [vmem:[#allocation5 + $0x28c] ss:$16 sps:$4 sm:$0xff]  }
  0x99   :  { %1885 = vmatpush2.bf16.msra.mxu1 %v2926_v15  ;;  %1773 = vmatprep.subr.bf16.mxu0 %v2937_v16  ;;  %v3306_v15 = vld [vmem:[#allocation3 + $0x74] ss:$24 sps:$4 sm:$0xff]   ;;  %v2989_v16 = vld [vmem:[#allocation5 + $0x288] ss:$16 sps:$4 sm:$0xff]  }
  0x9a   :  { %1886 = vmatprep.subr.bf16.mxu1 %v2940_v19  ;;  %v2992_v19 = vld [vmem:[#allocation5 + $0x488] ss:$16 sps:$4 sm:$0xff]  }
  0x9b   :  { %1616 = vmatmul.mubr.bf16.gmra.mxu0 %v3274_v20 }
  0x9c   :  { %1729 = vmatmul.mubr.bf16.gmra.mxu1 %v3276_v21  ;;  %1774 = vmatpush2.bf16.msra.mxu0 %v2935_v22  ;;  %v3003_v22 = vld [vmem:[#allocation5 + $0x46c] ss:$16 sps:$4 sm:$0xff]  }
  0x9d   :  { %1887 = vmatpush2.bf16.msra.mxu1 %v2938_v25  ;;  %1775 = vmatprep.subr.bf16.mxu0 %v2943_v26  ;;  %v3312_v25 = vld [vmem:[#allocation3 + $0x70] ss:$24 sps:$4 sm:$0xff]  }
  0x9e   :  { %1888 = vmatprep.subr.bf16.mxu1 %v2946_v27  ;;  %1625 = vmatprep.mubr.bf16.mxu0 %v3278_v28  ;;  %v2998_v26 = vld [vmem:[#allocation5 + $0x268] ss:$16 sps:$4 sm:$0xff]  }
  0x9f   :  { %1738 = vmatprep.mubr.bf16.mxu1 %v3280_v31  ;;  %v3001_v27 = vld [vmem:[#allocation5 + $0x468] ss:$16 sps:$4 sm:$0xff]  }
  0xa0   :  { %1776 = vmatpush2.bf16.msra.mxu0 %v2941_v32  ;;  %v3006_v32 = vld [vmem:[#allocation5 + $0x24c] ss:$16 sps:$4 sm:$0xff]  }
  0xa1   :  { %1889 = vmatpush2.bf16.msra.mxu1 %v2944_v33  ;;  %1777 = vmatprep.subr.bf16.mxu0 %v2955_v34  ;;  %v3314_v33 = vld [vmem:[#allocation3 + $0xa4] ss:$24 sps:$4 sm:$0xff]   ;;  %v3004_v34 = vld [vmem:[#allocation5 + $0x248] ss:$16 sps:$4 sm:$0xff]  }
  0xa2   :  { %1890 = vmatprep.subr.bf16.mxu1 %v2958_v37  ;;  %v3007_v37 = vld [vmem:[#allocation5 + $0x448] ss:$16 sps:$4 sm:$0xff]  }
  0xa3   :  { %1626 = vmatmul.mubr.bf16.gmra.mxu0 %v3286_v38 }
  0xa4   :  { %1739 = vmatmul.mubr.bf16.gmra.mxu1 %v3288_v39  ;;  %1778 = vmatpush2.bf16.msra.mxu0 %v2953_v40  ;;  %v3018_v40 = vld [vmem:[#allocation5 + $0x42c] ss:$16 sps:$4 sm:$0xff]  }
  0xa5   :  { %1891 = vmatpush2.bf16.msra.mxu1 %v2956_v43  ;;  %1779 = vmatprep.subr.bf16.mxu0 %v2961_v44  ;;  %v3320_v43 = vld [vmem:[#allocation3 + $0xa0] ss:$24 sps:$4 sm:$0xff]  }
  0xa6   :  { %1892 = vmatprep.subr.bf16.mxu1 %v2964_v45  ;;  %1781 = vmatprep.mubr.bf16.mxu0 %v3290_v46  ;;  %v3013_v44 = vld [vmem:[#allocation5 + $0x228] ss:$16 sps:$4 sm:$0xff]  }
  0xa7   :  { %1894 = vmatprep.mubr.bf16.mxu1 %v3199_v50  ;;  %v2988_v50 = vld [vmem:[#allocation5 + $0x4ac] ss:$16 sps:$4 sm:$0xff]   ;;  %v3016_v45 = vld [vmem:[#allocation5 + $0x428] ss:$16 sps:$4 sm:$0xff]  }
  0xa8   :  { %1780 = vmatpush2.bf16.msra.mxu0 %v2959_v49  ;;  %v3021_v49 = vld [vmem:[#allocation5 + $0x20c] ss:$16 sps:$4 sm:$0xff]  }
  0xa9   :  { %1893 = vmatpush2.bf16.msra.mxu1 %v2962_v51  ;;  %1975 = vmatprep.subr.bf16.mxu0 %v2970_v52  ;;  %v3322_v51 = vld [vmem:[#allocation3 + $0xd4] ss:$24 sps:$4 sm:$0xff]   ;;  %v3019_v52 = vld [vmem:[#allocation5 + $0x208] ss:$16 sps:$4 sm:$0xff]  }
  0xaa   :  { %2088 = vmatprep.subr.bf16.mxu1 %v2973_v53  ;;  %v3022_v53 = vld [vmem:[#allocation5 + $0x408] ss:$16 sps:$4 sm:$0xff]  }
  0xab   :  { %1782 = vmatmul.mubr.bf16.vlgmr.msra.gmra.mxu0 %v3294_v56 }
  0xac   :  { %1895 = vmatmul.mubr.bf16.vlgmr.msra.gmra.mxu1 %v3202_v5  ;;  %1976 = vmatpush1.bf16.msra.mxu0 %v2968_v57  ;;  %v2994_v5 = vld [vmem:[#allocation5 + $0x48c] ss:$16 sps:$4 sm:$0xff]  }
  0xad   :  { %2089 = vmatpush1.bf16.msra.mxu1 %v2971_v58  ;;  %1977 = vmatprep.subr.bf16.mxu0 %v2976_v59  ;;  %v3033_v57 = vld [vmem:[#allocation5 + $0x5ec] ss:$16 sps:$4 sm:$0xff]   ;;  %v3328_v58 = vld [vmem:[#allocation3 + $0xd0] ss:$24 sps:$4 sm:$0xff]  }
  0xae   :  { %2090 = vmatprep.subr.bf16.mxu1 %v2979_v62  ;;  %1791 = vmatprep.mubr.bf16.mxu0 %v3298_v63  ;;  %v3028_v59 = vld [vmem:[#allocation5 + $0x3e8] ss:$16 sps:$4 sm:$0xff]  }
  0xaf   :  { %1904 = vmatprep.mubr.bf16.mxu1 %v3206_v11  ;;  %v3000_v11 = vld [vmem:[#allocation5 + $0x26c] ss:$16 sps:$4 sm:$0xff]   ;;  %v3031_v62 = vld [vmem:[#allocation5 + $0x5e8] ss:$16 sps:$4 sm:$0xff]  }
  0xb0   :  { %1978 = vmatpush1.bf16.msra.mxu0 %v2974_v0  ;;  %v3039_v0 = vld [vmem:[#allocation5 + $0x5cc] ss:$16 sps:$4 sm:$0xff]  }
  0xb1   :  { %2091 = vmatpush1.bf16.msra.mxu1 %v2977_v1  ;;  %1979 = vmatprep.subr.bf16.mxu0 %v2985_v4  ;;  %v3330_v1 = vld [vmem:[#allocation3 + $0x104] ss:$24 sps:$4 sm:$0xff]   ;;  %v3034_v4 = vld [vmem:[#allocation5 + $0x3c8] ss:$16 sps:$4 sm:$0xff]  }
  0xb2   :  { %2092 = vmatprep.subr.bf16.mxu1 %v2988_v50  ;;  %v3045_v50 = vld [vmem:[#allocation5 + $0x3ac] ss:$16 sps:$4 sm:$0xff]  }
  0xb3   :  { %1792 = vmatmul.mubr.bf16.gmra.mxu0 %v3304_v7 }
  0xb4   :  { %1905 = vmatmul.mubr.bf16.gmra.mxu1 %v3214_v17  ;;  %1980 = vmatpush1.bf16.msra.mxu0 %v2983_v8  ;;  %v3009_v17 = vld [vmem:[#allocation5 + $0x44c] ss:$16 sps:$4 sm:$0xff]  }
  0xb5   :  { %2093 = vmatpush1.bf16.msra.mxu1 %v2986_v9  ;;  %1981 = vmatprep.subr.bf16.mxu0 %v2991_v14  ;;  %v3048_v8 = vld [vmem:[#allocation5 + $0x5ac] ss:$16 sps:$4 sm:$0xff]   ;;  %v3336_v9 = vld [vmem:[#allocation3 + $0x100] ss:$24 sps:$4 sm:$0xff]  }
  0xb6   :  { %2094 = vmatprep.subr.bf16.mxu1 %v2994_v5  ;;  %1801 = vmatprep.mubr.bf16.mxu0 %v3306_v15  ;;  %v3043_v14 = vld [vmem:[#allocation5 + $0x3a8] ss:$16 sps:$4 sm:$0xff]  }
  0xb7   :  { %1914 = vmatprep.mubr.bf16.mxu1 %v3218_v23  ;;  %v3015_v23 = vld [vmem:[#allocation5 + $0x22c] ss:$16 sps:$4 sm:$0xff]   ;;  %v3046_v5 = vld [vmem:[#allocation5 + $0x5a8] ss:$16 sps:$4 sm:$0xff]  }
  0xb8   :  { %1982 = vmatpush1.bf16.msra.mxu0 %v2989_v16  ;;  %v3054_v16 = vld [vmem:[#allocation5 + $0x58c] ss:$16 sps:$4 sm:$0xff]  }
  0xb9   :  { %2095 = vmatpush1.bf16.msra.mxu1 %v2992_v19  ;;  %1983 = vmatprep.subr.bf16.mxu0 %v3000_v11  ;;  %v3338_v19 = vld [vmem:[#allocation3 + $0x134] ss:$24 sps:$4 sm:$0xff]   ;;  %v3049_v11 = vld [vmem:[#allocation5 + $0x388] ss:$16 sps:$4 sm:$0xff]  }
  0xba   :  { %2096 = vmatprep.subr.bf16.mxu1 %v3003_v22  ;;  %v3060_v22 = vld [vmem:[#allocation5 + $0x36c] ss:$16 sps:$4 sm:$0xff]  }
  0xbb   :  { %1802 = vmatmul.mubr.bf16.gmra.mxu0 %v3312_v25 }
  0xbc   :  { %1915 = vmatmul.mubr.bf16.gmra.mxu1 %v3226_v29  ;;  %1984 = vmatpush1.bf16.msra.mxu0 %v2998_v26  ;;  %v3024_v29 = vld [vmem:[#allocation5 + $0x40c] ss:$16 sps:$4 sm:$0xff]  }
  0xbd   :  { %2097 = vmatpush1.bf16.msra.mxu1 %v3001_v27  ;;  %1985 = vmatprep.subr.bf16.mxu0 %v3006_v32  ;;  %v3063_v26 = vld [vmem:[#allocation5 + $0x56c] ss:$16 sps:$4 sm:$0xff]   ;;  %v3344_v27 = vld [vmem:[#allocation3 + $0x130] ss:$24 sps:$4 sm:$0xff]  }
  0xbe   :  { %2098 = vmatprep.subr.bf16.mxu1 %v3009_v17  ;;  %1811 = vmatprep.mubr.bf16.mxu0 %v3314_v33  ;;  %v3058_v32 = vld [vmem:[#allocation5 + $0x368] ss:$16 sps:$4 sm:$0xff]  }
  0xbf   :  { %1924 = vmatprep.mubr.bf16.mxu1 %v3230_v35  ;;  %v3030_v35 = vld [vmem:[#allocation5 + $0x3ec] ss:$16 sps:$4 sm:$0xff]   ;;  %v3061_v17 = vld [vmem:[#allocation5 + $0x568] ss:$16 sps:$4 sm:$0xff]  }
  0xc0   :  { %1986 = vmatpush1.bf16.msra.mxu0 %v3004_v34  ;;  %v3069_v34 = vld [vmem:[#allocation5 + $0x54c] ss:$16 sps:$4 sm:$0xff]  }
  0xc1   :  { %2099 = vmatpush1.bf16.msra.mxu1 %v3007_v37  ;;  %1987 = vmatprep.subr.bf16.mxu0 %v3015_v23  ;;  %v3070_v37 = vld [vmem:[#allocation3 + $0x164] ss:$24 sps:$4 sm:$0xff]   ;;  %v3064_v23 = vld [vmem:[#allocation5 + $0x348] ss:$16 sps:$4 sm:$0xff]  }
  0xc2   :  { %2100 = vmatprep.subr.bf16.mxu1 %v3018_v40  ;;  %v3067_v40 = vld [vmem:[#allocation5 + $0x548] ss:$16 sps:$4 sm:$0xff]  }
  0xc3   :  { %1812 = vmatmul.mubr.bf16.gmra.mxu0 %v3320_v43 }
  0xc4   :  { %1925 = vmatmul.mubr.bf16.gmra.mxu1 %v3238_v41  ;;  %1988 = vmatpush1.bf16.msra.mxu0 %v3013_v44  ;;  %v3036_v41 = vld [vmem:[#allocation5 + $0x3cc] ss:$16 sps:$4 sm:$0xff]  }
  0xc5   :  { %2101 = vmatpush1.bf16.msra.mxu1 %v3016_v45  ;;  %1989 = vmatprep.subr.bf16.mxu0 %v3021_v49  ;;  %v3078_v44 = vld [vmem:[#allocation5 + $0x52c] ss:$16 sps:$4 sm:$0xff]   ;;  %v3072_v45 = vld [vmem:[#allocation3 + $0x160] ss:$24 sps:$4 sm:$0xff]  }
  0xc6   :  { %2102 = vmatprep.subr.bf16.mxu1 %v3024_v29  ;;  %1821 = vmatprep.mubr.bf16.mxu0 %v3322_v51  ;;  %v3073_v49 = vld [vmem:[#allocation5 + $0x328] ss:$16 sps:$4 sm:$0xff]  }
  0xc7   :  { %1934 = vmatprep.mubr.bf16.mxu1 %v3242_v47  ;;  %v3037_v47 = vld [vmem:[#allocation5 + $0x5c8] ss:$16 sps:$4 sm:$0xff]  }
  0xc8   :  { %1990 = vmatpush1.bf16.msra.mxu0 %v3019_v52  ;;  %v3076_v29 = vld [vmem:[#allocation5 + $0x528] ss:$16 sps:$4 sm:$0xff]   ;;  %v3081_v52 = vld [vmem:[#allocation5 + $0x30c] ss:$16 sps:$4 sm:$0xff]  }
  0xc9   :  { %2103 = vmatpush1.bf16.msra.mxu1 %v3022_v53  ;;  %1991 = vmatprep.subr.bf16.mxu0 %v3030_v35  ;;  %v3079_v53 = vld [vmem:[#allocation5 + $0x308] ss:$16 sps:$4 sm:$0xff]  }
  0xca   :  { %2104 = vmatprep.subr.bf16.mxu1 %v3033_v57  ;;  %v3082_v35 = vld [vmem:[#allocation5 + $0x508] ss:$16 sps:$4 sm:$0xff]   ;;  %v3085_v57 = vld [vmem:[#allocation3 + $0xc] ss:$24 sps:$4 sm:$0xff]  }
  0xcb   :  { %1822 = vmatmul.mubr.bf16.gmra.mxu0 %v3328_v58 }
  0xcc   :  { %1935 = vmatmul.mubr.bf16.gmra.mxu1 %v3250_v54  ;;  %1992 = vmatpush2.bf16.msra.mxu0 %v3028_v59  ;;  %v3051_v54 = vld [vmem:[#allocation5 + $0x38c] ss:$16 sps:$4 sm:$0xff]  }
  0xcd   :  { %2105 = vmatpush2.bf16.msra.mxu1 %v3031_v62  ;;  %1993 = vmatprep.subr.bf16.mxu0 %v3036_v41 }
  0xce   :  { %2106 = vmatprep.subr.bf16.mxu1 %v3039_v0  ;;  %1831 = vmatprep.mubr.bf16.mxu0 %v3330_v1 }
  0xcf   :  { %1944 = vmatprep.mubr.bf16.mxu1 %v3254_v60  ;;  %v3052_v60 = vld [vmem:[#allocation5 + $0x588] ss:$16 sps:$4 sm:$0xff]  }
  0xd0   :  { %1994 = vmatpush2.bf16.msra.mxu0 %v3034_v4 }
  0xd1   :  { %2107 = vmatpush2.bf16.msra.mxu1 %v3037_v47  ;;  %1995 = vmatprep.subr.bf16.mxu0 %v3045_v50 }
  0xd2   :  { %2108 = vmatprep.subr.bf16.mxu1 %v3048_v8 }
  0xd3   :  { %1832 = vmatmul.mubr.bf16.gmra.mxu0 %v3336_v9 }
  0xd4   :  { %1945 = vmatmul.mubr.bf16.gmra.mxu1 %v3262_v2  ;;  %1996 = vmatpush2.bf16.msra.mxu0 %v3043_v14  ;;  %v3066_v2 = vld [vmem:[#allocation5 + $0x34c] ss:$16 sps:$4 sm:$0xff]  }
  0xd5   :  { %2109 = vmatpush2.bf16.msra.mxu1 %v3046_v5  ;;  %1997 = vmatprep.subr.bf16.mxu0 %v3051_v54 }
  0xd6   :  { %2110 = vmatprep.subr.bf16.mxu1 %v3054_v16  ;;  %1841 = vmatprep.mubr.bf16.mxu0 %v3338_v19 }
  0xd7   :  { %1954 = vmatprep.mubr.bf16.mxu1 %v3266_v10  ;;  %v3075_v10 = vld [vmem:[#allocation5 + $0x32c] ss:$16 sps:$4 sm:$0xff]  }
  0xd8   :  { %1998 = vmatpush2.bf16.msra.mxu0 %v3049_v11 }
  0xd9   :  { %2111 = vmatpush2.bf16.msra.mxu1 %v3052_v60  ;;  %1999 = vmatprep.subr.bf16.mxu0 %v3060_v22 }
  0xda   :  { %2112 = vmatprep.subr.bf16.mxu1 %v3063_v26 }
  0xdb   :  { %1842 = vmatmul.mubr.bf16.gmra.mxu0 %v3344_v27 }
  0xdc   :  { %1955 = vmatmul.mubr.bf16.gmra.mxu1 %v3274_v20  ;;  %2000 = vmatpush2.bf16.msra.mxu0 %v3058_v32  ;;  %v3084_v20 = vld [vmem:[#allocation5 + $0x50c] ss:$16 sps:$4 sm:$0xff]  }
  0xdd   :  { %2113 = vmatpush2.bf16.msra.mxu1 %v3061_v17  ;;  %2001 = vmatprep.subr.bf16.mxu0 %v3066_v2 }
  0xde   :  { %2114 = vmatprep.subr.bf16.mxu1 %v3069_v34  ;;  %1851 = vmatprep.mubr.bf16.mxu0 %v3070_v37 }
  0xdf   :  { %1964 = vmatprep.mubr.bf16.mxu1 %v3278_v28 }
  0xe0   :  { %2002 = vmatpush2.bf16.msra.mxu0 %v3064_v23 }
  0xe1   :  { %2115 = vmatpush2.bf16.msra.mxu1 %v3067_v40  ;;  %2003 = vmatprep.subr.bf16.mxu0 %v3075_v10 }
  0xe2   :  { %2116 = vmatprep.subr.bf16.mxu1 %v3078_v44 }
  0xe3   :  { %1852 = vmatmul.mubr.bf16.gmra.mxu0 %v3072_v45 }
  0xe4   :  { %1965 = vmatmul.mubr.bf16.gmra.mxu1 %v3286_v38  ;;  %2004 = vmatpush2.bf16.msra.mxu0 %v3073_v49 }
  0xe5   :  { %2117 = vmatpush2.bf16.msra.mxu1 %v3076_v29  ;;  %2005 = vmatprep.subr.bf16.mxu0 %v3081_v52 }
  0xe6   :  { %2118 = vmatprep.subr.bf16.mxu1 %v3084_v20  ;;  %2007 = vmatprep.mubr.bf16.mxu0 %v3085_v57 }
  0xe7   :  { %2120 = vmatprep.mubr.bf16.mxu1 %v3290_v46 }
  0xe8   :  { %2006 = vmatpush2.bf16.msra.mxu0 %v3079_v53 }
  0xe9   :  { %2119 = vmatpush2.bf16.msra.mxu1 %v3082_v35 }
  0xeb   :  { %2008 = vmatmul.mubr.bf16.vlgmr.msra.gmra.mxu0 %v3204_v6  ;;  %v303_v6 = vlaneseq }
  0xec   :  { %2121 = vmatmul.mubr.bf16.vlgmr.msra.gmra.mxu1 %v3294_v56  ;;  %2017 = vmatprep.mubr.bf16.mxu0 %v3208_v12 }
  0xed   :  { %2130 = vmatprep.mubr.bf16.mxu1 %v3298_v63  ;;  %v3378_v12 = vshrl.u32 %v303_v6, 7 }
  0xf3   :  { %2018 = vmatmul.mubr.bf16.gmra.mxu0 %v3216_v18  ;;  %v305_v18 = vsub.s32 0, %v3378_v12 }
  0xf4   :  { %2131 = vmatmul.mubr.bf16.gmra.mxu1 %v3304_v7  ;;  %2027 = vmatprep.mubr.bf16.mxu0 %v3220_v24  ;;  %v3385_v24 = vld [vmem:[%s3858_s2] sm:$0xf] }
  0xf5   :  { %2140 = vmatprep.mubr.bf16.mxu1 %v3306_v15 }
  0xfb   :  { %2028 = vmatmul.mubr.bf16.gmra.mxu0 %v3228_v30  ;;  %v309_v30 = vsub.s32 1, %v3378_v12 }
  0xfc   :  { %2141 = vmatmul.mubr.bf16.gmra.mxu1 %v3312_v25  ;;  %2037 = vmatprep.mubr.bf16.mxu0 %v3232_v36  ;;  %v3391_v36 = vrot.slane %v3385_v24, %v305_v18 }
  0xfd   :  { %2150 = vmatprep.mubr.bf16.mxu1 %v3314_v33 }
 0x103   :  { %2038 = vmatmul.mubr.bf16.gmra.mxu0 %v3240_v42  ;;  %v3396_v42 = vrot.slane %v3385_v24, %v309_v30 }
 0x104   :  { %2151 = vmatmul.mubr.bf16.gmra.mxu1 %v3320_v43  ;;  %2047 = vmatprep.mubr.bf16.mxu0 %v3244_v48 }
 0x105   :  { %2160 = vmatprep.mubr.bf16.mxu1 %v3322_v51 }
 0x10b   :  { %2048 = vmatmul.mubr.bf16.gmra.mxu0 %v3252_v55 }
 0x10c   :  { %2161 = vmatmul.mubr.bf16.gmra.mxu1 %v3328_v58  ;;  %2057 = vmatprep.mubr.bf16.mxu0 %v3256_v61 }
 0x10d   :  { %2170 = vmatprep.mubr.bf16.mxu1 %v3330_v1 }
 0x113   :  { %2058 = vmatmul.mubr.bf16.gmra.mxu0 %v3264_v3 }
 0x114   :  { %2171 = vmatmul.mubr.bf16.gmra.mxu1 %v3336_v9  ;;  %2067 = vmatprep.mubr.bf16.mxu0 %v3268_v13 }
 0x115   :  { %2180 = vmatprep.mubr.bf16.mxu1 %v3338_v19 }
 0x11b   :  { %2068 = vmatmul.mubr.bf16.gmra.mxu0 %v3276_v21 }
 0x11c   :  { %2181 = vmatmul.mubr.bf16.gmra.mxu1 %v3344_v27  ;;  %2077 = vmatprep.mubr.bf16.mxu0 %v3280_v31 }
 0x11d   :  { %2190 = vmatprep.mubr.bf16.mxu1 %v3070_v37 }
 0x123   :  { %2078 = vmatmul.mubr.bf16.gmra.mxu0 %v3288_v39 }
 0x124   :  { %2191 = vmatmul.mubr.bf16.gmra.mxu1 %v3072_v45 }
 0x12b   :  { %v1557_v48 = vpop.f32.mrf.mxu0 }
 0x12c   :  { %v1670_v55 = vpop.f32.mrf.mxu1  ;;  %v1558_v61 = vadd.f32 %v1557_v48, %v3391_v36 }
 0x12d   :  { %v1559_v3 = vpop.f32.mrf.mxu0 }
 0x12e   :  { %v1672_v13 = vpop.f32.mrf.mxu1  ;;  %v3399_v21 = vadd.f32 %v1670_v55, %v1558_v61  ;;  %v1560_v28 = vadd.f32 %v1559_v3, %v3396_v42 }
 0x12f   :  { %v1561_v31 = vpop.f32.mrf.mxu0 }
 0x130   :  { %v1674_v38 = vpop.f32.mrf.mxu1  ;;  %v3402_v39 = vadd.f32 %v1672_v13, %v1560_v28  ;;  %v1562_v46 = vadd.f32 %v1561_v31, %v3391_v36 }
 0x131   :  { %v1563_v56 = vpop.f32.mrf.mxu0 }
 0x132   :  { %v1676_v63 = vpop.f32.mrf.mxu1  ;;  %v3405_v7 = vadd.f32 %v1674_v38, %v1562_v46  ;;  %v1564_v15 = vadd.f32 %v1563_v56, %v3396_v42 }
 0x133   :  { %v1567_v25 = vpop.f32.mrf.mxu0 }
 0x134   :  { %v1680_v33 = vpop.f32.mrf.mxu1  ;;  %v3408_v43 = vadd.f32 %v1676_v63, %v1564_v15  ;;  %v1568_v51 = vadd.f32 %v1567_v25, %v3391_v36 }
 0x135   :  { %v1569_v58 = vpop.f32.mrf.mxu0 }
 0x136   :  { %v1682_v59 = vpop.f32.mrf.mxu1  ;;  %v3411_v62 = vadd.f32 %v1680_v33, %v1568_v51  ;;  %v1570_v41 = vadd.f32 %v1569_v58, %v3396_v42 }
 0x137   :  { %v1571_v0 = vpop.f32.mrf.mxu0 }
 0x138   :  { %v1684_v1 = vpop.f32.mrf.mxu1  ;;  %v3414_v4 = vadd.f32 %v1682_v59, %v1570_v41  ;;  %v1572_v47 = vadd.f32 %v1571_v0, %v3391_v36 }
 0x139   :  { %v1573_v50 = vpop.f32.mrf.mxu0 }
 0x13a   :  { %v1686_v8 = vpop.f32.mrf.mxu1  ;;  %v3417_v9 = vadd.f32 %v1684_v1, %v1572_v47  ;;  %v1574_v14 = vadd.f32 %v1573_v50, %v3396_v42 }
 0x13b   :  { %v1577_v5 = vpop.f32.mrf.mxu0 }
 0x13c   :  { %v1690_v54 = vpop.f32.mrf.mxu1  ;;  %v3420_v16 = vadd.f32 %v1686_v8, %v1574_v14  ;;  %v1578_v19 = vadd.f32 %v1577_v5, %v3391_v36 }
 0x13d   :  { %v1579_v11 = vpop.f32.mrf.mxu0 }
 0x13e   :  { %v1692_v60 = vpop.f32.mrf.mxu1  ;;  %v3423_v22 = vadd.f32 %v1690_v54, %v1578_v19  ;;  %v1580_v26 = vadd.f32 %v1579_v11, %v3396_v42 }
 0x13f   :  { %v1581_v27 = vpop.f32.mrf.mxu0 }
 0x140   :  { %v1694_v32 = vpop.f32.mrf.mxu1  ;;  %v3426_v17 = vadd.f32 %v1692_v60, %v1580_v26  ;;  %v1582_v2 = vadd.f32 %v1581_v27, %v3391_v36 }
 0x141   :  { %v1583_v34 = vpop.f32.mrf.mxu0 }
 0x142   :  { %v1696_v37 = vpop.f32.mrf.mxu1  ;;  %v3429_v23 = vadd.f32 %v1694_v32, %v1582_v2  ;;  %v1584_v40 = vadd.f32 %v1583_v34, %v3396_v42 }
 0x143   :  { %v1587_v10 = vpop.f32.mrf.mxu0 }
 0x144   :  { %v1700_v44 = vpop.f32.mrf.mxu1  ;;  %v3432_v45 = vadd.f32 %v1696_v37, %v1584_v40  ;;  %v1588_v49 = vadd.f32 %v1587_v10, %v3391_v36 }
 0x145   :  { %v1589_v29 = vpop.f32.mrf.mxu0 }
 0x146   :  { %v1702_v52 = vpop.f32.mrf.mxu1  ;;  %v3435_v20 = vadd.f32 %v1700_v44, %v1588_v49  ;;  %v1590_v53 = vadd.f32 %v1589_v29, %v3396_v42 }
 0x147   :  { %v1591_v35 = vpop.f32.mrf.mxu0 }
 0x148   :  { %v1704_v57 = vpop.f32.mrf.mxu1  ;;  %v3438_v6 = vadd.f32 %v1702_v52, %v1590_v53  ;;  %v1592_v48 = vadd.f32 %v1591_v35, %v3391_v36 }
 0x149   :  { %v1593_v55 = vpop.f32.mrf.mxu0 }
 0x14a   :  { %v1706_v61 = vpop.f32.mrf.mxu1  ;;  %v3441_v3 = vadd.f32 %v1704_v57, %v1592_v48  ;;  %v1594_v13 = vadd.f32 %v1593_v55, %v3396_v42 }
 0x14b   :  { %v1597_v28 = vpop.f32.mrf.mxu0 }
 0x14c   :  { %v1710_v31 = vpop.f32.mrf.mxu1  ;;  %v3444_v38 = vadd.f32 %v1706_v61, %v1594_v13  ;;  %v1598_v46 = vadd.f32 %v1597_v28, %v3391_v36 }
 0x14d   :  { %v1599_v56 = vpop.f32.mrf.mxu0 }
 0x14e   :  { %v1712_v63 = vpop.f32.mrf.mxu1  ;;  %v3447_v15 = vadd.f32 %v1710_v31, %v1598_v46  ;;  %v1600_v25 = vadd.f32 %v1599_v56, %v3396_v42 }
 0x14f   :  { %v1601_v33 = vpop.f32.mrf.mxu0 }
 0x150   :  { %v1714_v51 = vpop.f32.mrf.mxu1  ;;  %v3450_v58 = vadd.f32 %v1712_v63, %v1600_v25  ;;  %v1602_v59 = vadd.f32 %v1601_v33, %v3391_v36 }
 0x151   :  { %v1603_v41 = vpop.f32.mrf.mxu0 }
 0x152   :  { %v1716_v0 = vpop.f32.mrf.mxu1  ;;  %v3453_v1 = vadd.f32 %v1714_v51, %v1602_v59  ;;  %v1604_v47 = vadd.f32 %v1603_v41, %v3396_v42 }
 0x153   :  { %v1607_v50 = vpop.f32.mrf.mxu0 }
 0x154   :  { %v1720_v8 = vpop.f32.mrf.mxu1  ;;  %v3456_v14 = vadd.f32 %v1716_v0, %v1604_v47  ;;  %v1608_v5 = vadd.f32 %v1607_v50, %v3391_v36 }
 0x155   :  { %v1609_v54 = vpop.f32.mrf.mxu0 }
 0x156   :  { %v1722_v19 = vpop.f32.mrf.mxu1  ;;  %v3459_v11 = vadd.f32 %v1720_v8, %v1608_v5  ;;  %v1610_v60 = vadd.f32 %v1609_v54, %v3396_v42 }
 0x157   :  { %v1611_v26 = vpop.f32.mrf.mxu0 }
 0x158   :  { %v1724_v27 = vpop.f32.mrf.mxu1  ;;  %v3462_v32 = vadd.f32 %v1722_v19, %v1610_v60  ;;  %v1612_v2 = vadd.f32 %v1611_v26, %v3391_v36 }
 0x159   :  { %v1613_v34 = vpop.f32.mrf.mxu0 }
 0x15a   :  { %v1726_v37 = vpop.f32.mrf.mxu1  ;;  %v3465_v40 = vadd.f32 %v1724_v27, %v1612_v2  ;;  %v1614_v10 = vadd.f32 %v1613_v34, %v3396_v42 }
 0x15b   :  { %v1617_v44 = vpop.f32.mrf.mxu0 }
 0x15c   :  { %v1730_v49 = vpop.f32.mrf.mxu1  ;;  %v3468_v29 = vadd.f32 %v1726_v37, %v1614_v10  ;;  %v1618_v52 = vadd.f32 %v1617_v44, %v3391_v36 }
 0x15d   :  { %v1619_v53 = vpop.f32.mrf.mxu0 }
 0x15e   :  { %v1732_v35 = vpop.f32.mrf.mxu1  ;;  %v3471_v57 = vadd.f32 %v1730_v49, %v1618_v52  ;;  %v1620_v48 = vadd.f32 %v1619_v53, %v3396_v42  ;;  %v3497_v49 = vld [vmem:[#allocation7] sm:$0xf] }
 0x15f   :  { %v1621_v55 = vpop.f32.mrf.mxu0 }
 0x160   :  { %v1734_v61 = vpop.f32.mrf.mxu1  ;;  %v3474_v13 = vadd.f32 %v1732_v35, %v1620_v48  ;;  %v1622_v28 = vadd.f32 %v1621_v55, %v3391_v36  ;;  %v3505_v35 = vrot.slane %v3497_v49, %v309_v30  ;;  %v3510_v48 = vrot.slane %v3497_v49, %v305_v18 }
 0x161   :  { %v1623_v31 = vpop.f32.mrf.mxu0 }
 0x162   :  { %v1736_v46 = vpop.f32.mrf.mxu1  ;;  %v3477_v56 = vadd.f32 %v1734_v61, %v1622_v28  ;;  %v1624_v63 = vadd.f32 %v1623_v31, %v3396_v42 }
 0x163   :  { %v1627_v25 = vpop.f32.mrf.mxu0 }
 0x164   :  { %v1740_v33 = vpop.f32.mrf.mxu1  ;;  %v3480_v51 = vadd.f32 %v1736_v46, %v1624_v63  ;;  %v1628_v59 = vadd.f32 %v1627_v25, %v3391_v36 }
 0x165   :  { %v1629_v41 = vpop.f32.mrf.mxu0 }
 0x166   :  { %v1742_v0 = vpop.f32.mrf.mxu1  ;;  %v3483_v47 = vadd.f32 %v1740_v33, %v1628_v59  ;;  %v1630_v50 = vadd.f32 %v1629_v41, %v3396_v42 }
 0x167   :  { %v1631_v8 = vpop.f32.mrf.mxu0 }
 0x168   :  { %v1744_v5 = vpop.f32.mrf.mxu1  ;;  %v3486_v54 = vadd.f32 %v1742_v0, %v1630_v50  ;;  %v1632_v19 = vadd.f32 %v1631_v8, %v3391_v36 }
 0x169   :  { %v1633_v60 = vpop.f32.mrf.mxu0 }
 0x16a   :  { %v1746_v26 = vpop.f32.mrf.mxu1  ;;  %v3489_v27 = vadd.f32 %v1744_v5, %v1632_v19  ;;  %v1634_v2 = vadd.f32 %v1633_v60, %v3396_v42 }
 0x16b   :  { %v1783_v34 = vpop.f32.mrf.mxu0 }
 0x16c   :  { %v3492_v37 = vpop.f32.mrf.mxu1  ;;  %v3494_v10 = vadd.f32 %v1746_v26, %v1634_v2  ;;  %v1784_v44 = vadd.f32 %v1783_v34, %v3399_v21 }
 0x16d   :  { %v1785_v52 = vpop.f32.mrf.mxu0 }
 0x16e   :  { %v3499_v53 = vpop.f32.mrf.mxu1  ;;  %v1786_v36 = vadd.f32 %v1785_v52, %v3402_v39  ;;  %v2201_v42 = vmax.f32 %v1784_v44, 0.0 }
 0x16f   :  { %v1787_v55 = vpop.f32.mrf.mxu0 }
 0x170   :  { %v3512_v21 = vpop.f32.mrf.mxu1  ;;  %v2202_v61 = vmax.f32 %v1786_v36, 0.0  ;;  %v1788_v28 = vadd.f32 %v1787_v55, %v3405_v7  ;;  %v2287_v25 = vmul.f32 %v3510_v48, %v2201_v42 }
 0x171   :  { %v1789_v31 = vpop.f32.mrf.mxu0 }
 0x172   :  { %v3515_v46 = vpop.f32.mrf.mxu1  ;;  %v2288_v39 = vmul.f32 %v3505_v35, %v2202_v61  ;;  %v2205_v63 = vmax.f32 %v1788_v28, 0.0  ;;  %v1790_v30 = vadd.f32 %v1789_v31, %v3408_v43 }
 0x173   :  { %v1793_v33 = vpop.f32.mrf.mxu0 }
 0x174   :  { %v3520_v59 = vpop.f32.mrf.mxu1  ;;  %v2206_v18 = vmax.f32 %v1790_v30, 0.0  ;;  %v1794_v41 = vadd.f32 %v1793_v33, %v3411_v62  ;;  %v3525_v7 = vadd.f32 %v2288_v39, %v2287_v25  ;;  %v2291_v8 = vmul.f32 %v3510_v48, %v2205_v63 }
 0x175   :  { %v1795_v0 = vpop.f32.mrf.mxu0 }
 0x176   :  { %v3523_v50 = vpop.f32.mrf.mxu1  ;;  %v2292_v5 = vmul.f32 %v3505_v35, %v2206_v18  ;;  %v1796_v19 = vadd.f32 %v1795_v0, %v3414_v4  ;;  %v2209_v43 = vmax.f32 %v1794_v41, 0.0 }
 0x177   :  { %v1797_v60 = vpop.f32.mrf.mxu0 }
 0x178   :  { %v3530_v26 = vpop.f32.mrf.mxu1  ;;  %v3532_v2 = vadd.f32 %v2292_v5, %v2291_v8  ;;  %v2210_v34 = vmax.f32 %v1796_v19, 0.0  ;;  %v1798_v62 = vadd.f32 %v1797_v60, %v3417_v9  ;;  %v2295_v61 = vmul.f32 %v3510_v48, %v2209_v43 }
 0x179   :  { %v1799_v44 = vpop.f32.mrf.mxu0 }
 0x17a   :  { %v3535_v52 = vpop.f32.mrf.mxu1  ;;  %v2296_v36 = vmul.f32 %v3505_v35, %v2210_v34  ;;  %v2213_v42 = vmax.f32 %v1798_v62, 0.0  ;;  %v1800_v55 = vadd.f32 %v1799_v44, %v3420_v16 }
 0x17b   :  { %v1803_v4 = vpop.f32.mrf.mxu0 }
 0x17c   :  { %v3540_v28 = vpop.f32.mrf.mxu1  ;;  %v2214_v31 = vmax.f32 %v1800_v55, 0.0  ;;  %v1804_v39 = vadd.f32 %v1803_v4, %v3423_v22  ;;  %v3545_v9 = vadd.f32 %v2296_v36, %v2295_v61  ;;  %v2299_v25 = vmul.f32 %v3510_v48, %v2213_v42 }
 0x17d   :  { %v1805_v63 = vpop.f32.mrf.mxu0 }
 0x17e   :  { %v3543_v30 = vpop.f32.mrf.mxu1  ;;  %v2300_v33 = vmul.f32 %v3505_v35, %v2214_v31  ;;  %v2217_v18 = vmax.f32 %v1804_v39, 0.0  ;;  %v1806_v16 = vadd.f32 %v1805_v63, %v3426_v17 }
 0x17f   :  { %v1807_v41 = vpop.f32.mrf.mxu0 }
 0x180   :  { %v3550_v0 = vpop.f32.mrf.mxu1  ;;  %v3552_v8 = vadd.f32 %v2300_v33, %v2299_v25  ;;  %v2218_v5 = vmax.f32 %v1806_v16, 0.0  ;;  %v1808_v22 = vadd.f32 %v1807_v41, %v3429_v23  ;;  %v2303_v60 = vmul.f32 %v3510_v48, %v2217_v18 }
 0x181   :  { %v1809_v19 = vpop.f32.mrf.mxu0 }
 0x182   :  { %v3555_v43 = vpop.f32.mrf.mxu1  ;;  %v2304_v34 = vmul.f32 %v3505_v35, %v2218_v5  ;;  %v2221_v62 = vmax.f32 %v1808_v22, 0.0  ;;  %v1810_v44 = vadd.f32 %v1809_v19, %v3432_v45 }
 0x183   :  { %v1813_v36 = vpop.f32.mrf.mxu0 }
 0x184   :  { %v3560_v17 = vpop.f32.mrf.mxu1  ;;  %v3562_v42 = vadd.f32 %v2304_v34, %v2303_v60  ;;  %v2222_v55 = vmax.f32 %v1810_v44, 0.0  ;;  %v1814_v61 = vadd.f32 %v1813_v36, %v3435_v20  ;;  %v2307_v31 = vmul.f32 %v3510_v48, %v2221_v62 }
 0x185   :  { %v1815_v4 = vpop.f32.mrf.mxu0 }
 0x186   :  { %v3565_v23 = vpop.f32.mrf.mxu1  ;;  %v2308_v39 = vmul.f32 %v3505_v35, %v2222_v55  ;;  %v2225_v63 = vmax.f32 %v1814_v61, 0.0  ;;  %v1816_v25 = vadd.f32 %v1815_v4, %v3438_v6 }
 0x187   :  { %v1817_v33 = vpop.f32.mrf.mxu0 }
 0x188   :  { %v3570_v45 = vpop.f32.mrf.mxu1  ;;  %v3572_v18 = vadd.f32 %v2308_v39, %v2307_v31  ;;  %v2226_v16 = vmax.f32 %v1816_v25, 0.0  ;;  %v1818_v41 = vadd.f32 %v1817_v33, %v3441_v3  ;;  %v2311_v22 = vmul.f32 %v3510_v48, %v2225_v63 }
 0x189   :  { %v1819_v5 = vpop.f32.mrf.mxu0 }
 0x18a   :  { %v3575_v20 = vpop.f32.mrf.mxu1  ;;  %v2312_v19 = vmul.f32 %v3505_v35, %v2226_v16  ;;  %v2229_v60 = vmax.f32 %v1818_v41, 0.0  ;;  %v1820_v34 = vadd.f32 %v1819_v5, %v3444_v38 }
 0x18b   :  { %v1823_v62 = vpop.f32.mrf.mxu0 }
 0x18c   :  { %v3580_v6 = vpop.f32.mrf.mxu1  ;;  %v3582_v44 = vadd.f32 %v2312_v19, %v2311_v22  ;;  %v2230_v36 = vmax.f32 %v1820_v34, 0.0  ;;  %v1824_v55 = vadd.f32 %v1823_v62, %v3447_v15  ;;  %v2315_v4 = vmul.f32 %v3510_v48, %v2229_v60 }
 0x18d   :  { %v1825_v61 = vpop.f32.mrf.mxu0 }
 0x18e   :  { %v3585_v3 = vpop.f32.mrf.mxu1  ;;  %v2316_v31 = vmul.f32 %v3505_v35, %v2230_v36  ;;  %v2233_v39 = vmax.f32 %v1824_v55, 0.0  ;;  %v1826_v63 = vadd.f32 %v1825_v61, %v3450_v58 }
 0x18f   :  { %v1827_v25 = vpop.f32.mrf.mxu0 }
 0x190   :  { %v3590_v38 = vpop.f32.mrf.mxu1  ;;  %v3592_v33 = vadd.f32 %v2316_v31, %v2315_v4  ;;  %v2234_v16 = vmax.f32 %v1826_v63, 0.0  ;;  %v1828_v41 = vadd.f32 %v1827_v25, %v3453_v1  ;;  %v2319_v22 = vmul.f32 %v3510_v48, %v2233_v39 }
 0x191   :  { %v1829_v5 = vpop.f32.mrf.mxu0 }
 0x192   :  { %v3595_v15 = vpop.f32.mrf.mxu1  ;;  %v2320_v19 = vmul.f32 %v3505_v35, %v2234_v16  ;;  %v2237_v60 = vmax.f32 %v1828_v41, 0.0  ;;  %v1830_v34 = vadd.f32 %v1829_v5, %v3456_v14 }
 0x193   :  { %v1833_v62 = vpop.f32.mrf.mxu0 }
 0x194   :  { %v3600_v58 = vpop.f32.mrf.mxu1  ;;  %v3602_v36 = vadd.f32 %v2320_v19, %v2319_v22  ;;  %v2238_v55 = vmax.f32 %v1830_v34, 0.0  ;;  %v1834_v61 = vadd.f32 %v1833_v62, %v3459_v11  ;;  %v2323_v31 = vmul.f32 %v3510_v48, %v2237_v60 }
 0x195   :  { %v1835_v4 = vpop.f32.mrf.mxu0 }
 0x196   :  { %v3605_v1 = vpop.f32.mrf.mxu1  ;;  %v2324_v39 = vmul.f32 %v3505_v35, %v2238_v55  ;;  %v2241_v63 = vmax.f32 %v1834_v61, 0.0  ;;  %v1836_v25 = vadd.f32 %v1835_v4, %v3462_v32 }
 0x197   :  { %v1837_v16 = vpop.f32.mrf.mxu0 }
 0x198   :  { %v3610_v14 = vpop.f32.mrf.mxu1  ;;  %v3612_v41 = vadd.f32 %v2324_v39, %v2323_v31  ;;  %v2242_v5 = vmax.f32 %v1836_v25, 0.0  ;;  %v1838_v22 = vadd.f32 %v1837_v16, %v3465_v40  ;;  %v2327_v34 = vmul.f32 %v3510_v48, %v2241_v63 }
 0x199   :  { %v1839_v19 = vpop.f32.mrf.mxu0 }
 0x19a   :  { %3862 = vst [vmem:[#allocation10_spill] sm:$0xff] %v3612_v41  ;;  %v3615_v11 = vpop.f32.mrf.mxu1  ;;  %v2328_v60 = vmul.f32 %v3505_v35, %v2242_v5  ;;  %v2245_v62 = vmax.f32 %v1838_v22, 0.0  ;;  %v1840_v55 = vadd.f32 %v1839_v19, %v3468_v29 }
 0x19b   :  { %v1843_v61 = vpop.f32.mrf.mxu0 }
 0x19c   :  { %v3620_v32 = vpop.f32.mrf.mxu1  ;;  %v3622_v4 = vadd.f32 %v2328_v60, %v2327_v34  ;;  %v2246_v31 = vmax.f32 %v1840_v55, 0.0  ;;  %v1844_v39 = vadd.f32 %v1843_v61, %v3471_v57  ;;  %v2331_v16 = vmul.f32 %v3510_v48, %v2245_v62 }
 0x19d   :  { %v1845_v25 = vpop.f32.mrf.mxu0  ;;  %v313_v57 = vsub.s32 2, %v3378_v12 }
 0x19e   :  { %3863 = vst [vmem:[#allocation11_spill] sm:$0xff] %v3622_v4  ;;  %v3625_v40 = vpop.f32.mrf.mxu1  ;;  %v2332_v63 = vmul.f32 %v3505_v35, %v2246_v31  ;;  %v2249_v41 = vmax.f32 %v1844_v39, 0.0  ;;  %v1846_v5 = vadd.f32 %v1845_v25, %v3474_v13 }
 0x19f   :  { %v1847_v22 = vpop.f32.mrf.mxu0 }
 0x1a0   :  { %v3630_v29 = vpop.f32.mrf.mxu1  ;;  %v3632_v19 = vadd.f32 %v2332_v63, %v2331_v16  ;;  %v2250_v34 = vmax.f32 %v1846_v5, 0.0  ;;  %v1848_v60 = vadd.f32 %v1847_v22, %v3477_v56  ;;  %v2335_v62 = vmul.f32 %v3510_v48, %v2249_v41 }
 0x1a1   :  { %v1849_v55 = vpop.f32.mrf.mxu0  ;;  %v317_v16 = vsub.s32 3, %v3378_v12  ;;  %v3648_v22 = vrot.slane %v3385_v24, %v313_v57 }
 0x1a2   :  { %3864 = vst [vmem:[#allocation12_spill] sm:$0xff] %v3632_v19  ;;  %v3636_v61 = vpop.f32.mrf.mxu1  ;;  %v2336_v31 = vmul.f32 %v3505_v35, %v2250_v34  ;;  %v2253_v39 = vmax.f32 %v1848_v60, 0.0  ;;  %v1850_v13 = vadd.f32 %v1849_v55, %v3480_v51 }
 0x1a3   :  { %v1853_v25 = vpop.f32.mrf.mxu0 }
 0x1a4   :  { %v3641_v4 = vpop.f32.mrf.mxu1  ;;  %v3644_v63 = vadd.f32 %v2336_v31, %v2335_v62  ;;  %v2254_v56 = vmax.f32 %v1850_v13, 0.0  ;;  %v1854_v5 = vadd.f32 %v1853_v25, %v3483_v47  ;;  %v2339_v34 = vmul.f32 %v3510_v48, %v2253_v39 }
 0x1a5   :  { %3865 = vst [vmem:[#allocation13_spill] sm:$0xff] %v3641_v4  ;;  %v1855_v19 = vpop.f32.mrf.mxu0  ;;  %v3658_v62 = vrot.slane %v3385_v24, %v317_v16  ;;  %v1897_v25 = vadd.f32 %v3492_v37, %v3648_v22  ;;  %v1901_v37 = vadd.f32 %v3512_v21, %v3648_v22 }
 0x1a6   :  { %3866 = vst [vmem:[#allocation14_spill] sm:$0xff] %v3644_v63  ;;  %v3650_v41 = vpop.f32.mrf.mxu1  ;;  %v2340_v51 = vmul.f32 %v3505_v35, %v2254_v56  ;;  %v2257_v60 = vmax.f32 %v1854_v5, 0.0  ;;  %v1856_v55 = vadd.f32 %v1855_v19, %v3486_v54 }
 0x1a7   :  { %v1857_v4 = vpop.f32.mrf.mxu0 }
 0x1a8   :  { %v3655_v12 = vpop.f32.mrf.mxu1  ;;  %v3660_v47 = vadd.f32 %v2340_v51, %v2339_v34  ;;  %v2258_v31 = vmax.f32 %v1856_v55, 0.0  ;;  %v1858_v13 = vadd.f32 %v1857_v4, %v3489_v27  ;;  %v2343_v56 = vmul.f32 %v3510_v48, %v2257_v60 }
 0x1a9   :  { %3867 = vst [vmem:[#allocation15_spill] sm:$0xff] %v3655_v12  ;;  %v1859_v39 = vpop.f32.mrf.mxu0  ;;  %v1899_v34 = vadd.f32 %v3499_v53, %v3658_v62  ;;  %v3677_v55 = vrot.slane %v3497_v49, %v313_v57  ;;  %v1903_v53 = vadd.f32 %v3515_v46, %v3658_v62 }
 0x1aa   :  { %3868 = vst [vmem:[#allocation16_spill] sm:$0xff] %v3660_v47  ;;  %v3665_v63 = vpop.f32.mrf.mxu1  ;;  %v2344_v54 = vmul.f32 %v3505_v35, %v2258_v31  ;;  %v2261_v19 = vmax.f32 %v1858_v13, 0.0  ;;  %v1860_v5 = vadd.f32 %v1859_v39, %v3494_v10 }
 0x1ab   :  { %v2009_v24 = vpop.f32.mrf.mxu0 }
 0x1ac   :  { %v2122_v12 = vpop.f32.mrf.mxu1  ;;  %v3672_v51 = vadd.f32 %v2344_v54, %v2343_v56  ;;  %v2262_v27 = vmax.f32 %v1860_v5, 0.0  ;;  %v2010_v4 = vadd.f32 %v2009_v24, %v1897_v25  ;;  %v2347_v13 = vmul.f32 %v3510_v48, %v2261_v19 }
 0x1ad   :  { %v2011_v60 = vpop.f32.mrf.mxu0  ;;  %v3684_v25 = vrot.slane %v3497_v49, %v317_v16  ;;  %v1907_v48 = vadd.f32 %v3520_v59, %v3648_v22  ;;  %v1911_v59 = vadd.f32 %v3530_v26, %v3648_v22 }
 0x1ae   :  { %v2124_v31 = vpop.f32.mrf.mxu1  ;;  %v2348_v10 = vmul.f32 %v3505_v35, %v2262_v27  ;;  %v2123_v39 = vadd.f32 %v2122_v12, %v2010_v4  ;;  %v2012_v47 = vadd.f32 %v2011_v60, %v1899_v34  ;;  %v1909_v4 = vadd.f32 %v3523_v50, %v3658_v62 }
 0x1af   :  { %v2013_v56 = vpop.f32.mrf.mxu0  ;;  %v1913_v50 = vadd.f32 %v3535_v52, %v3658_v62 }
 0x1b0   :  { %v2126_v54 = vpop.f32.mrf.mxu1  ;;  %v3686_v21 = vadd.f32 %v2348_v10, %v2347_v13  ;;  %v2203_v57 = vmax.f32 %v2123_v39, 0.0  ;;  %v2125_v5 = vadd.f32 %v2124_v31, %v2012_v47  ;;  %v2014_v24 = vadd.f32 %v2013_v56, %v1901_v37 }
 0x1b1   :  { %v2015_v19 = vpop.f32.mrf.mxu0 }
 0x1b2   :  { %v2128_v35 = vpop.f32.mrf.mxu1  ;;  %v2289_v12 = vmul.f32 %v3677_v55, %v2203_v57  ;;  %v2204_v34 = vmax.f32 %v2125_v5, 0.0  ;;  %v2127_v27 = vadd.f32 %v2126_v54, %v2014_v24  ;;  %v2016_v46 = vadd.f32 %v2015_v19, %v1903_v53 }
 0x1b3   :  { %v2019_v49 = vpop.f32.mrf.mxu0 }
 0x1b4   :  { %v2132_v16 = vpop.f32.mrf.mxu1  ;;  %v2207_v60 = vmax.f32 %v2127_v27, 0.0  ;;  %v2129_v13 = vadd.f32 %v2128_v35, %v2016_v46  ;;  %v2020_v10 = vadd.f32 %v2019_v49, %v1907_v48  ;;  %v2290_v47 = vmul.f32 %v3684_v25, %v2204_v34 }
 0x1b5   :  { %v2021_v37 = vpop.f32.mrf.mxu0  ;;  %v2352_v39 = vadd.f32 %v3525_v7, %v2289_v12  ;;  %v1917_v27 = vadd.f32 %v3540_v28, %v3648_v22 }
 0x1b6   :  { %v2134_v31 = vpop.f32.mrf.mxu1  ;;  %v2293_v56 = vmul.f32 %v3677_v55, %v2207_v60  ;;  %v2208_v53 = vmax.f32 %v2129_v13, 0.0  ;;  %v2133_v54 = vadd.f32 %v2132_v16, %v2020_v10  ;;  %v2022_v57 = vadd.f32 %v2021_v37, %v1909_v4 }
 0x1b7   :  { %v2023_v5 = vpop.f32.mrf.mxu0  ;;  %v2353_v48 = vadd.f32 %v2352_v39, %v2290_v47  ;;  %v1919_v60 = vadd.f32 %v3543_v30, %v3658_v62  ;;  %v1921_v39 = vadd.f32 %v3550_v0, %v3648_v22 }
 0x1b8   :  { %v2136_v24 = vpop.f32.mrf.mxu1  ;;  %v2294_v19 = vmul.f32 %v3684_v25, %v2208_v53  ;;  %v2211_v35 = vmax.f32 %v2133_v54, 0.0  ;;  %v2135_v34 = vadd.f32 %v2134_v31, %v2022_v57  ;;  %v2024_v26 = vadd.f32 %v2023_v5, %v1911_v59 }
 0x1b9   :  { %2354 = vadd.xlane.f32.xlu0 %v2353_v48  ;;  %v2025_v7 = vpop.f32.mrf.mxu0  ;;  %v2357_v46 = vadd.f32 %v3532_v2, %v2293_v56  ;;  %v1923_v5 = vadd.f32 %v3555_v43, %v3658_v62 }
 0x1ba   :  { %v2138_v12 = vpop.f32.mrf.mxu1  ;;  %v2297_v4 = vmul.f32 %v3677_v55, %v2211_v35  ;;  %v2212_v49 = vmax.f32 %v2135_v34, 0.0  ;;  %v2137_v52 = vadd.f32 %v2136_v24, %v2024_v26  ;;  %v2026_v16 = vadd.f32 %v2025_v7, %v1913_v50 }
 0x1bb   :  { %v2029_v13 = vpop.f32.mrf.mxu0  ;;  %v2358_v47 = vadd.f32 %v2357_v46, %v2294_v19 }
 0x1bc   :  { %v2142_v10 = vpop.f32.mrf.mxu1  ;;  %v2215_v59 = vmax.f32 %v2137_v52, 0.0  ;;  %v2139_v37 = vadd.f32 %v2138_v12, %v2026_v16  ;;  %v2030_v31 = vadd.f32 %v2029_v13, %v1917_v27  ;;  %v2298_v28 = vmul.f32 %v3684_v25, %v2212_v49 }
 0x1bd   :  { %2359 = vadd.xlane.f32.xlu0 %v2358_v47  ;;  %v2031_v2 = vpop.f32.mrf.mxu0  ;;  %v2362_v53 = vadd.f32 %v3545_v9, %v2297_v4  ;;  %v1927_v27 = vadd.f32 %v3560_v17, %v3648_v22  ;;  %v1929_v52 = vadd.f32 %v3565_v23, %v3658_v62 }
 0x1be   :  { %v2144_v56 = vpop.f32.mrf.mxu1  ;;  %v2301_v54 = vmul.f32 %v3677_v55, %v2215_v59  ;;  %v2216_v57 = vmax.f32 %v2139_v37, 0.0  ;;  %v2143_v30 = vadd.f32 %v2142_v10, %v2030_v31  ;;  %v2032_v50 = vadd.f32 %v2031_v2, %v1919_v60 }
 0x1bf   :  { %v2033_v24 = vpop.f32.mrf.mxu0  ;;  %v2363_v19 = vadd.f32 %v2362_v53, %v2298_v28  ;;  %v1931_v37 = vadd.f32 %v3570_v45, %v3648_v22  ;;  %v1933_v53 = vadd.f32 %v3575_v20, %v3658_v62 }
 0x1c0   :  { %v2146_v48 = vpop.f32.mrf.mxu1  ;;  %v2302_v35 = vmul.f32 %v3684_v25, %v2216_v57  ;;  %v2219_v34 = vmax.f32 %v2143_v30, 0.0  ;;  %v2145_v0 = vadd.f32 %v2144_v56, %v2032_v50  ;;  %v2034_v26 = vadd.f32 %v2033_v24, %v1921_v39 }
 0x1c1   :  { %2364 = vadd.xlane.f32.xlu1 %v2363_v19  ;;  %v2035_v9 = vpop.f32.mrf.mxu0  ;;  %v2367_v12 = vadd.f32 %v3552_v8, %v2301_v54 }
 0x1c2   :  { %v2148_v7 = vpop.f32.mrf.mxu1  ;;  %v2305_v46 = vmul.f32 %v3677_v55, %v2219_v34  ;;  %v2220_v4 = vmax.f32 %v2145_v0, 0.0  ;;  %v2147_v43 = vadd.f32 %v2146_v48, %v2034_v26  ;;  %v2036_v49 = vadd.f32 %v2035_v9, %v1923_v5 }
 0x1c3   :  { %v2039_v16 = vpop.f32.mrf.mxu0  ;;  %v2368_v13 = vadd.f32 %v2367_v12, %v2302_v35  ;;  %v1937_v48 = vadd.f32 %v3580_v6, %v3648_v22 }
 0x1c4   :  { %v2152_v60 = vpop.f32.mrf.mxu1  ;;  %v2306_v10 = vmul.f32 %v3684_v25, %v2220_v4  ;;  %v2223_v47 = vmax.f32 %v2147_v43, 0.0  ;;  %v2149_v17 = vadd.f32 %v2148_v7, %v2036_v49  ;;  %v2040_v59 = vadd.f32 %v2039_v16, %v1927_v27 }
 0x1c5   :  { %2369 = vadd.xlane.f32.xlu1 %v2368_v13  ;;  %v2041_v8 = vpop.f32.mrf.mxu0  ;;  %v2372_v28 = vadd.f32 %v3562_v42, %v2305_v46  ;;  %v1939_v27 = vadd.f32 %v3585_v3, %v3658_v62  ;;  %v1941_v49 = vadd.f32 %v3590_v38, %v3648_v22 }
 0x1c6   :  { %v2154_v31 = vpop.f32.mrf.mxu1  ;;  %v2309_v39 = vmul.f32 %v3677_v55, %v2223_v47  ;;  %v2224_v2 = vmax.f32 %v2149_v17, 0.0  ;;  %v2153_v23 = vadd.f32 %v2152_v60, %v2040_v59  ;;  %v2042_v56 = vadd.f32 %v2041_v8, %v1929_v52 }
 0x1c7   :  { %v2043_v54 = vpop.f32.mrf.mxu0  ;;  %v2373_v30 = vadd.f32 %v2372_v28, %v2306_v10  ;;  %v1943_v47 = vadd.f32 %v3595_v15, %v3658_v62 }
 0x1c8   :  { %v2156_v57 = vpop.f32.mrf.mxu1  ;;  %v2310_v50 = vmul.f32 %v3684_v25, %v2224_v2  ;;  %v2227_v5 = vmax.f32 %v2153_v23, 0.0  ;;  %v2155_v45 = vadd.f32 %v2154_v31, %v2042_v56  ;;  %v2044_v24 = vadd.f32 %v2043_v54, %v1931_v37 }
 0x1c9   :  { %2374 = vadd.xlane.f32.xlu0 %v2373_v30  ;;  %v2045_v42 = vpop.f32.mrf.mxu0  ;;  %v2377_v35 = vadd.f32 %v3572_v18, %v2309_v39  ;;  %v1947_v39 = vadd.f32 %v3600_v58, %v3648_v22 }
 0x1ca   :  { %v2158_v19 = vpop.f32.mrf.mxu1  ;;  %v2313_v34 = vmul.f32 %v3677_v55, %v2227_v5  ;;  %v2228_v0 = vmax.f32 %v2155_v45, 0.0  ;;  %v2157_v20 = vadd.f32 %v2156_v57, %v2044_v24  ;;  %v2046_v26 = vadd.f32 %v2045_v42, %v1933_v53 }
 0x1cb   :  { %v2049_v9 = vpop.f32.mrf.mxu0  ;;  %v2378_v12 = vadd.f32 %v2377_v35, %v2310_v50  ;;  %v1949_v57 = vadd.f32 %v3605_v1, %v3658_v62  ;;  %v1951_v42 = vadd.f32 %v3610_v14, %v3648_v22 }
 0x1cc   :  { %v2162_v7 = vpop.f32.mrf.mxu1  ;;  %v2314_v46 = vmul.f32 %v3684_v25, %v2228_v0  ;;  %v2231_v4 = vmax.f32 %v2157_v20, 0.0  ;;  %v2159_v6 = vadd.f32 %v2158_v19, %v2046_v26  ;;  %v2050_v43 = vadd.f32 %v2049_v9, %v1937_v48 }
 0x1cd   :  { %2379 = vadd.xlane.f32.xlu1 %v2378_v12  ;;  %v2051_v18 = vpop.f32.mrf.mxu0  ;;  %v2382_v16 = vadd.f32 %v3582_v44, %v2313_v34  ;;  %v1953_v26 = vadd.f32 %v3615_v11, %v3658_v62 }
 0x1ce   :  { %v2164_v52 = vpop.f32.mrf.mxu1  ;;  %v2317_v60 = vmul.f32 %v3677_v55, %v2231_v4  ;;  %v2232_v13 = vmax.f32 %v2159_v6, 0.0  ;;  %v2163_v3 = vadd.f32 %v2162_v7, %v2050_v43  ;;  %v2052_v10 = vadd.f32 %v2051_v18, %v1939_v27 }
 0x1cf   :  { %v2053_v17 = vpop.f32.mrf.mxu0  ;;  %v2383_v37 = vadd.f32 %v2382_v16, %v2314_v46  ;;  %v1957_v6 = vadd.f32 %v3620_v32, %v3648_v22 }
 0x1d0   :  { %v2166_v59 = vpop.f32.mrf.mxu1  ;;  %v2318_v8 = vmul.f32 %v3684_v25, %v2232_v13  ;;  %v2235_v31 = vmax.f32 %v2163_v3, 0.0  ;;  %v2165_v38 = vadd.f32 %v2164_v52, %v2052_v10  ;;  %v2054_v28 = vadd.f32 %v2053_v17, %v1941_v49  ;;  %v3869_v49 = vld [vmem:[#allocation10_spill] sm:$0xff] }
 0x1d1   :  { %2384 = vadd.xlane.f32.xlu0 %v2383_v37  ;;  %v2055_v44 = vpop.f32.mrf.mxu0  ;;  %v2387_v23 = vadd.f32 %v3592_v33, %v2317_v60  ;;  %v1959_v13 = vadd.f32 %v3625_v40, %v3658_v62 }
 0x1d2   :  { %v2168_v2 = vpop.f32.mrf.mxu1  ;;  %v2321_v56 = vmul.f32 %v3677_v55, %v2235_v31  ;;  %v2236_v53 = vmax.f32 %v2165_v38, 0.0  ;;  %v2167_v15 = vadd.f32 %v2166_v59, %v2054_v28  ;;  %v2056_v54 = vadd.f32 %v2055_v44, %v1943_v47  ;;  %v3870_v28 = vld [vmem:[#allocation11_spill] sm:$0xff] }
 0x1d3   :  { %v2059_v30 = vpop.f32.mrf.mxu0  ;;  %v2388_v5 = vadd.f32 %v2387_v23, %v2318_v8  ;;  %v1961_v8 = vadd.f32 %v3630_v29, %v3648_v22 }
 0x1d4   :  { %v2172_v50 = vpop.f32.mrf.mxu1  ;;  %v2322_v45 = vmul.f32 %v3684_v25, %v2236_v53  ;;  %v2239_v24 = vmax.f32 %v2167_v15, 0.0  ;;  %v2169_v58 = vadd.f32 %v2168_v2, %v2056_v54  ;;  %v2060_v48 = vadd.f32 %v2059_v30, %v1947_v39 }
 0x1d5   :  { %2389 = vadd.xlane.f32.xlu1 %v2388_v5  ;;  %v2061_v33 = vpop.f32.mrf.mxu0  ;;  %v2392_v35 = vadd.f32 %v3602_v36, %v2321_v56  ;;  %v1963_v56 = vadd.f32 %v3636_v61, %v3658_v62  ;;  %v3871_v5 = vld [vmem:[#allocation13_spill] sm:$0xff] }
 0x1d6   :  { %v2174_v19 = vpop.f32.mrf.mxu1  ;;  %v2325_v34 = vmul.f32 %v3677_v55, %v2239_v24  ;;  %v2240_v0 = vmax.f32 %v2169_v58, 0.0  ;;  %v2173_v1 = vadd.f32 %v2172_v50, %v2060_v48  ;;  %v2062_v20 = vadd.f32 %v2061_v33, %v1949_v57  ;;  %v3872_v48 = vld [vmem:[#allocation12_spill] sm:$0xff] }
 0x1d7   :  { %v2063_v27 = vpop.f32.mrf.mxu0  ;;  %v2393_v7 = vadd.f32 %v2392_v35, %v2322_v45  ;;  %v1967_v45 = vadd.f32 %v3871_v5, %v3648_v22 }
 0x1d8   :  { %v2176_v9 = vpop.f32.mrf.mxu1  ;;  %v2326_v12 = vmul.f32 %v3684_v25, %v2240_v0  ;;  %v2243_v46 = vmax.f32 %v2173_v1, 0.0  ;;  %v2175_v14 = vadd.f32 %v2174_v19, %v2062_v20  ;;  %v2064_v4 = vadd.f32 %v2063_v27, %v1951_v42 }
 0x1d9   :  { %2394 = vadd.xlane.f32.xlu0 %v2393_v7  ;;  %v2065_v36 = vpop.f32.mrf.mxu0  ;;  %v2397_v18 = vadd.f32 %v3869_v49, %v2325_v34  ;;  %v1969_v34 = vadd.f32 %v3650_v41, %v3658_v62 }
 0x1da   :  { %v2178_v43 = vpop.f32.mrf.mxu1  ;;  %v2329_v52 = vmul.f32 %v3677_v55, %v2243_v46  ;;  %v2244_v16 = vmax.f32 %v2175_v14, 0.0  ;;  %v2177_v11 = vadd.f32 %v2176_v9, %v2064_v4  ;;  %v2066_v60 = vadd.f32 %v2065_v36, %v1953_v26 }
 0x1db   :  { %v2069_v3 = vpop.f32.mrf.mxu0  ;;  %v2398_v47 = vadd.f32 %v2397_v18, %v2326_v12  ;;  %v3873_v12 = vld [vmem:[#allocation15_spill] sm:$0xff] }
 0x1dc   :  { %v2182_v10 = vpop.f32.mrf.mxu1  ;;  %v2330_v17 = vmul.f32 %v3684_v25, %v2244_v16  ;;  %v2247_v59 = vmax.f32 %v2177_v11, 0.0  ;;  %v2179_v32 = vadd.f32 %v2178_v43, %v2066_v60  ;;  %v2070_v37 = vadd.f32 %v2069_v3, %v1957_v6  ;;  %v3874_v6 = vld [vmem:[#allocation14_spill] sm:$0xff] }
 0x1dd   :  { %2399 = vadd.xlane.f32.xlu1 %v2398_v47  ;;  %v2071_v31 = vpop.f32.mrf.mxu0  ;;  %v2402_v39 = vadd.f32 %v3870_v28, %v2329_v52  ;;  %v1971_v46 = vadd.f32 %v3873_v12, %v3648_v22  ;;  %v1973_v52 = vadd.f32 %v3665_v63, %v3658_v62 }
 0x1de   :  { %v2184_v38 = vpop.f32.mrf.mxu1  ;;  %v2333_v44 = vmul.f32 %v3677_v55, %v2247_v59  ;;  %v2248_v2 = vmax.f32 %v2179_v32, 0.0  ;;  %v2183_v40 = vadd.f32 %v2182_v10, %v2070_v37  ;;  %v2072_v23 = vadd.f32 %v2071_v31, %v1959_v13 }
 0x1df   :  { %v2073_v53 = vpop.f32.mrf.mxu0  ;;  %v2403_v54 = vadd.f32 %v2402_v39, %v2330_v17  ;;  %v3875_v17 = vld [vmem:[#allocation16_spill] sm:$0xff] }
 0x1e0   :  { %v2186_v15 = vpop.f32.mrf.mxu1  ;;  %v2334_v57 = vmul.f32 %v3684_v25, %v2248_v2  ;;  %v2251_v30 = vmax.f32 %v2183_v40, 0.0  ;;  %v2185_v29 = vadd.f32 %v2184_v38, %v2072_v23  ;;  %v2074_v50 = vadd.f32 %v2073_v53, %v1961_v8 }
 0x1e1   :  { %2404 = vadd.xlane.f32.xlu0 %v2403_v54  ;;  %v2075_v24 = vpop.f32.mrf.mxu0  ;;  %v2407_v42 = vadd.f32 %v3872_v48, %v2333_v44  ;;  %v2717_v54 = vld [vmem:[#allocation2] ss:$0 sm:$0xff] }
 0x1e2   :  { %v2188_v58 = vpop.f32.mrf.mxu1  ;;  %v2337_v33 = vmul.f32 %v3677_v55, %v2251_v30  ;;  %v2252_v19 = vmax.f32 %v2185_v29, 0.0  ;;  %v2187_v61 = vadd.f32 %v2186_v15, %v2074_v50  ;;  %v2076_v35 = vadd.f32 %v2075_v24, %v1963_v56 }
 0x1e3   :  { %v2079_v0 = vpop.f32.mrf.mxu0  ;;  %v2408_v20 = vadd.f32 %v2407_v42, %v2334_v57 }
 0x1e4   :  { %v2192_v1 = vpop.f32.mrf.mxu1  ;;  %v2338_v26 = vmul.f32 %v3684_v25, %v2252_v19  ;;  %v2255_v27 = vmax.f32 %v2187_v61, 0.0  ;;  %v2189_v9 = vadd.f32 %v2188_v58, %v2076_v35  ;;  %v2080_v7 = vadd.f32 %v2079_v0, %v1967_v45 }
 0x1e5   :  { %2409 = vadd.xlane.f32.xlu1 %v2408_v20  ;;  %v2081_v14 = vpop.f32.mrf.mxu0  ;;  %v2412_v36 = vadd.f32 %v3874_v6, %v2337_v33 }
 0x1e6   :  { %v2194_v4 = vpop.f32.mrf.mxu1  ;;  %v2341_v43 = vmul.f32 %v3677_v55, %v2255_v27  ;;  %v2256_v49 = vmax.f32 %v2189_v9, 0.0  ;;  %v2193_v41 = vadd.f32 %v2192_v1, %v2080_v7  ;;  %v2082_v18 = vadd.f32 %v2081_v14, %v1969_v34 }
 0x1e7   :  { %v2083_v16 = vpop.f32.mrf.mxu0  ;;  %v2413_v60 = vadd.f32 %v2412_v36, %v2338_v26 }
 0x1e8   :  { %v2196_v11 = vpop.f32.mrf.mxu1  ;;  %v2342_v13 = vmul.f32 %v3684_v25, %v2256_v49  ;;  %v2259_v3 = vmax.f32 %v2193_v41, 0.0  ;;  %v2195_v22 = vadd.f32 %v2194_v4, %v2082_v18  ;;  %v2084_v10 = vadd.f32 %v2083_v16, %v1971_v46 }
 0x1e9   :  { %2414 = vadd.xlane.f32.xlu0 %v2413_v60  ;;  %v2085_v47 = vpop.f32.mrf.mxu0  ;;  %v2417_v59 = vadd.f32 %v3875_v17, %v2341_v43 }
 0x1ea   :  { %v2345_v32 = vmul.f32 %v3677_v55, %v2259_v3  ;;  %v2260_v37 = vmax.f32 %v2195_v22, 0.0  ;;  %v2197_v8 = vadd.f32 %v2196_v11, %v2084_v10  ;;  %v2086_v31 = vadd.f32 %v2085_v47, %v1973_v52  ;;  %v2198_v38 = vpop.f32.mrf.mxu1 }
 0x1eb   :  { %v2418_v28 = vadd.f32 %v2417_v59, %v2342_v13 }
 0x1ec   :  { %v2346_v63 = vmul.f32 %v3684_v25, %v2260_v37  ;;  %v2263_v62 = vmax.f32 %v2197_v8, 0.0  ;;  %v2199_v39 = vadd.f32 %v2198_v38, %v2086_v31  ;;  %v2422_v44 = vadd.f32 %v3672_v51, %v2345_v32 }
 0x1ed   :  { %2419 = vadd.xlane.f32.xlu1 %v2418_v28 }
 0x1ee   :  { %v2349_v2 = vmul.f32 %v3677_v55, %v2263_v62  ;;  %v2264_v40 = vmax.f32 %v2199_v39, 0.0  ;;  %v2423_v23 = vadd.f32 %v2422_v44, %v2346_v63 }
 0x1f0   :  { %v2350_v56 = vmul.f32 %v3684_v25, %v2264_v40  ;;  %2424 = vadd.xlane.f32.xlu0 %v2423_v23  ;;  %v2427_v53 = vadd.f32 %v3686_v21, %v2349_v2 }
 0x1f2   :  { %v2428_v15 = vadd.f32 %v2427_v53, %v2350_v56 }
 0x1f4   :  { %2429 = vadd.xlane.f32.xlu1 %v2428_v15 }
 0x242   :  { %v2355_v57 = vpop.xlane.xlu0 %2354 }
 0x243   :  { %v2438_v30 = vadd.f32 %v2717_v54, %v2355_v57 }
 0x245   :  { %2455 = vst.msk [vmem:[%s3861_s5] sm:$0xff] %vm2454_vm0, %v2438_v30 }
 0x246   :  { %v2360_v51 = vpop.xlane.xlu0 %2359 }
 0x247   :  { %v2439_v55 = vadd.f32 %v2717_v54, %v2360_v51 }
 0x249   :  { %2456 = vst.msk [vmem:[%s3861_s5 + $0x8] sm:$0xff] %vm2454_vm0, %v2439_v55 }
 0x24a   :  { %v2365_v25 = vpop.xlane.xlu1 %2364 }
 0x24b   :  { %v2440_v21 = vadd.f32 %v2717_v54, %v2365_v25 }
 0x24d   :  { %2457 = vst.msk [vmem:[%s3861_s5 + $0x10] sm:$0xff] %vm2454_vm0, %v2440_v21 }
 0x24e   :  { %v2370_v29 = vpop.xlane.xlu1 %2369 }
 0x24f   :  { %v2441_v50 = vadd.f32 %v2717_v54, %v2370_v29 }
 0x251   :  { %2458 = vst.msk [vmem:[%s3861_s5 + $0x18] sm:$0xff] %vm2454_vm0, %v2441_v50 }
 0x252   :  { %v2375_v5 = vpop.xlane.xlu0 %2374 }
 0x253   :  { %v2442_v45 = vadd.f32 %v2717_v54, %v2375_v5 }
 0x255   :  { %2459 = vst.msk [vmem:[%s3861_s5 + $0x20] sm:$0xff] %vm2454_vm0, %v2442_v45 }
 0x256   :  { %v2380_v24 = vpop.xlane.xlu1 %2379 }
 0x257   :  { %v2443_v58 = vadd.f32 %v2717_v54, %v2380_v24 }
 0x259   :  { %2460 = vst.msk [vmem:[%s3861_s5 + $0x28] sm:$0xff] %vm2454_vm0, %v2443_v58 }
 0x25a   :  { %v2385_v48 = vpop.xlane.xlu0 %2384 }
 0x25b   :  { %v2444_v42 = vadd.f32 %v2717_v54, %v2385_v48 }
 0x25d   :  { %2461 = vst.msk [vmem:[%s3861_s5 + $0x30] sm:$0xff] %vm2454_vm0, %v2444_v42 }
 0x25e   :  { %v2390_v33 = vpop.xlane.xlu1 %2389 }
 0x25f   :  { %v2445_v19 = vadd.f32 %v2717_v54, %v2390_v33 }
 0x261   :  { %2462 = vst.msk [vmem:[%s3861_s5 + $0x38] sm:$0xff] %vm2454_vm0, %v2445_v19 }
 0x262   :  { %v2395_v61 = vpop.xlane.xlu0 %2394 }
 0x263   :  { %v2446_v35 = vadd.f32 %v2717_v54, %v2395_v61 }
 0x265   :  { %2463 = vst.msk [vmem:[%s3861_s5 + $0x40] sm:$0xff] %vm2454_vm0, %v2446_v35 }
 0x266   :  { %v2400_v34 = vpop.xlane.xlu1 %2399 }
 0x267   :  { %v2447_v0 = vadd.f32 %v2717_v54, %v2400_v34 }
 0x269   :  { %2464 = vst.msk [vmem:[%s3861_s5 + $0x48] sm:$0xff] %vm2454_vm0, %v2447_v0 }
 0x26a   :  { %v2405_v1 = vpop.xlane.xlu0 %2404 }
 0x26b   :  { %v2448_v20 = vadd.f32 %v2717_v54, %v2405_v1 }
 0x26d   :  { %2465 = vst.msk [vmem:[%s3861_s5 + $0x50] sm:$0xff] %vm2454_vm0, %v2448_v20 }
 0x26e   :  { %v2410_v26 = vpop.xlane.xlu1 %2409 }
 0x26f   :  { %v2449_v27 = vadd.f32 %v2717_v54, %v2410_v26 }
 0x271   :  { %2466 = vst.msk [vmem:[%s3861_s5 + $0x58] sm:$0xff] %vm2454_vm0, %v2449_v27 }
 0x272   :  { %v2415_v9 = vpop.xlane.xlu0 %2414 }
 0x273   :  { %v2450_v7 = vadd.f32 %v2717_v54, %v2415_v9 }
 0x275   :  { %2467 = vst.msk [vmem:[%s3861_s5 + $0x60] sm:$0xff] %vm2454_vm0, %v2450_v7 }
 0x276   :  { %v2420_v12 = vpop.xlane.xlu1 %2419 }
 0x277   :  { %v2451_v46 = vadd.f32 %v2717_v54, %v2420_v12 }
 0x279   :  { %2468 = vst.msk [vmem:[%s3861_s5 + $0x68] sm:$0xff] %vm2454_vm0, %v2451_v46  ;;  %v2425_v14 = vpop.xlane.xlu0 %2424 }
 0x27a   :  { %v2452_v4 = vadd.f32 %v2717_v54, %v2425_v14 }
 0x27c   :  { %2469 = vst.msk [vmem:[%s3861_s5 + $0x70] sm:$0xff] %vm2454_vm0, %v2452_v4 }
 0x27d   :  { %v2430_v6 = vpop.xlane.xlu1 %2429 }
 0x27e   :  { %v2453_v36 = vadd.f32 %v2717_v54, %v2430_v6 }
 0x280   :  { %2470 = vst.msk [vmem:[%s3861_s5 + $0x78] sm:$0xff] %vm2454_vm0, %v2453_v36 }
 0x281   :  { %2475 = vsyncpa [#allocation4], 1 }
 0x282   :  { %2476 = vsyncpa [#allocation6], 1 }

</bundles_post_ra>
